<compile_context>
chip_gen: v7x
topology: tpu7x:2x2x1
jax: 0.10.0
libtpu: 0.0.40
codegen_flags: <defaults>
</compile_context>

<pallas_src>
import functools

import jax
import jax.numpy as jnp
from jax.experimental import pallas as pl
from jax.experimental.pallas import tpu as pltpu


def _round_up(x, m):
    return ((x + m - 1) // m) * m


def _ffn_kernel(x_ref, wi_ref, wo_ref, o_ref, *, eps):
    # x_ref : (TILE_ROWS, d_model)   activation rows
    # wi_ref: (d_model, d_ff)        first linear, pre-transposed, gamma folded
    # wo_ref: (d_ff, d_model)        second linear, pre-transposed
    # o_ref : (TILE_ROWS, d_model)
    x = x_ref[...].astype(jnp.float32)

    # T5-style RMS LayerNorm (no mean subtraction, no bias), f32 math.
    # gamma is already folded into wi, so no per-step broadcast multiply here.
    variance = jnp.mean(x * x, axis=-1, keepdims=True)
    normed = (x * jax.lax.rsqrt(variance + eps)).astype(wi_ref.dtype)

    # Plain (M,K)@(K,N) matmuls on the MXU, f32 accumulation.
    h = jnp.dot(normed, wi_ref[...], preferred_element_type=jnp.float32)
    h = jnp.maximum(h, 0.0).astype(wo_ref.dtype)        # relu on f32 acc, then cast
    ff = jnp.dot(h, wo_ref[...], preferred_element_type=jnp.float32)

    # Residual add in f32; re-read x_ref so the f32 upcast isn't live across
    # both matmuls.
    o_ref[...] = (x_ref[...].astype(jnp.float32) + ff).astype(o_ref.dtype)


def _default_vmem_limit():
    try:
        cap = int(pltpu.get_tpu_info().vmem_capacity_bytes)
    except Exception:  # pragma: no cover - conservative fallback
        cap = 64 * 1024 * 1024
    # Leave headroom for compiler-internal scratch; cap at ~100 MiB.
    return max(32 * 1024 * 1024, min(cap - 8 * 1024 * 1024, 100 * 1024 * 1024))


def feed_forward(hidden_states, ln_weight, wi_weight, wo_weight, *,
                 eps=1e-6, tile_rows=512, weight_dtype=jnp.bfloat16,
                 vmem_limit_bytes=None):
    """hidden_states: (B, S, d_model).
    wi_weight: (d_ff, d_model) torch layout; wo_weight: (d_model, d_ff) torch
    layout. Weights are gamma-folded, transposed and cast once here (in a real
    model, do this at parameter-load time). Returns (B, S, d_model)."""
    B, S, d_model = hidden_states.shape
    d_ff = wi_weight.shape[0]
    N = B * S

    # One-time weight prep: fold gamma along the contraction (d_model) axis,
    # transpose to (K, N) layouts, cast to the compute dtype (bf16 by default).
    wi_t = jnp.transpose(
        wi_weight.astype(jnp.float32) * ln_weight.astype(jnp.float32)[None, :]
    ).astype(weight_dtype)                               # (d_model, d_ff)
    wo_t = jnp.transpose(wo_weight).astype(weight_dtype)  # (d_ff, d_model)

    # Row tiling: clamp so the grid has >= 2 steps (both v7x TCs get work),
    # keep tiles sublane-aligned. No host-side padding; the ragged last block
    # is handled by Pallas' out-of-bounds store masking.
    tile_rows = max(8, min(tile_rows, _round_up(pl.cdiv(N, 2), 8)))
    grid_rows = pl.cdiv(N, tile_rows)

    if vmem_limit_bytes is None:
        vmem_limit_bytes = _default_vmem_limit()

    x2d = hidden_states.reshape(N, d_model)
    kernel = functools.partial(_ffn_kernel, eps=eps)

    itemsize = jnp.dtype(hidden_states.dtype).itemsize
    cost = pl.CostEstimate(
        flops=4 * N * d_model * d_ff,
        transcendentals=N,  # one rsqrt per row
        bytes_accessed=(2 * N * d_model * itemsize
                        + wi_t.size * jnp.dtype(weight_dtype).itemsize
                        + wo_t.size * jnp.dtype(weight_dtype).itemsize))

    def _call(weight_spec_kwargs):
        in_specs = [
            pl.BlockSpec((tile_rows, d_model), lambda i: (i, 0)),
            pl.BlockSpec((d_model, d_ff), lambda i: (0, 0), **weight_spec_kwargs),
            pl.BlockSpec((d_ff, d_model), lambda i: (0, 0), **weight_spec_kwargs),
        ]
        return pl.pallas_call(
            kernel,
            out_shape=jax.ShapeDtypeStruct((N, d_model), hidden_states.dtype),
            grid_spec=pltpu.PrefetchScalarGridSpec(
                num_scalar_prefetch=0,
                grid=(grid_rows,),
                in_specs=in_specs,
                out_specs=pl.BlockSpec((tile_rows, d_model), lambda i: (i, 0)),
            ),
            compiler_params=pltpu.CompilerParams(
                dimension_semantics=("parallel",),
                vmem_limit_bytes=vmem_limit_bytes),
            cost_estimate=cost,
        )(x2d, wi_t, wo_t)

    try:
        # Grid-invariant weights: single-buffer them (double-buffering a block
        # whose index_map is constant just duplicates it in VMEM).
        out2d = _call(dict(pipeline_mode=pl.Buffered(1)))
    except Exception:
        # Fallback for jax versions that reject pipeline_mode on TPU
        # pallas_call BlockSpecs; default (double) buffering is still correct.
        out2d = _call({})

    return out2d.reshape(B, S, d_model)


def feed_forward_ref(hidden_states, ln_weight, wi_weight, wo_weight, eps=1e-6):
    x = hidden_states.astype(jnp.float32)
    variance = jnp.mean(x * x, axis=-1, keepdims=True)
    normed = ln_weight.astype(jnp.float32) * (x * jax.lax.rsqrt(variance + eps))
    h = jnp.maximum(normed @ wi_weight.T.astype(jnp.float32), 0.0)
    ff = h @ wo_weight.T.astype(jnp.float32)
    return (x + ff).astype(hidden_states.dtype)


if __name__ == "__main__":
    # Small config consistent with the module (d_model, d_ff scaled down).
    d_model, d_ff = 256, 1024
    eps = 1e-6

    key = jax.random.PRNGKey(0)
    kln, kwi, kwo, kx, kx2 = jax.random.split(key, 5)

    # nn.Linear weight shapes: wi (d_ff, d_model), wo (d_model, d_ff).
    ln_weight = 1.0 + 0.1 * jax.random.normal(kln, (d_model,), dtype=jnp.float32)
    wi_weight = jax.random.normal(kwi, (d_ff, d_model), dtype=jnp.float32) * 0.02
    wo_weight = jax.random.normal(kwo, (d_model, d_ff), dtype=jnp.float32) * 0.02

    # Case 1: batch=2, seq=8, default bf16 weights (bf16 rounding -> looser tol).
    x = jax.random.normal(kx, (2, 8, d_model), dtype=jnp.float32)
    out = feed_forward(x, ln_weight, wi_weight, wo_weight, eps=eps)
    out = jax.block_until_ready(out)
    ref = feed_forward_ref(x, ln_weight, wi_weight, wo_weight, eps=eps)
    assert out.shape == x.shape
    assert jnp.allclose(out, ref, atol=3e-2, rtol=3e-2), \
        float(jnp.max(jnp.abs(out - ref)))

    # Case 2: awkward row count (N=15) exercises the ragged-last-block path;
    # f32 weights for a tight numerical check.
    x2 = jax.random.normal(kx2, (3, 5, d_model), dtype=jnp.float32)
    out2 = feed_forward(x2, ln_weight, wi_weight, wo_weight, eps=eps,
                        weight_dtype=jnp.float32)
    out2 = jax.block_until_ready(out2)
    ref2 = feed_forward_ref(x2, ln_weight, wi_weight, wo_weight, eps=eps)
    assert out2.shape == x2.shape
    assert jnp.allclose(out2, ref2, atol=1e-4, rtol=1e-4), \
        float(jnp.max(jnp.abs(out2 - ref2)))

    print("KERNEL_OK")
</pallas_src>

<mosaic_0001>
module attributes {stable_mosaic.version = 11 : i64} {
  func.func @_ffn_kernel(%arg0: i32, %arg1: memref<8x256xf32, #tpu.memory_space<vmem>>, %arg2: memref<256x1024xbf16, #tpu.memory_space<vmem>>, %arg3: memref<1024x256xbf16, #tpu.memory_space<vmem>>, %arg4: memref<8x256xf32, #tpu.memory_space<vmem>>) attributes {dimension_semantics = [#tpu.dimension_semantics<parallel>], iteration_bounds = array<i64: 2>, scalar_prefetch = 0 : i64, scratch_operands = 0 : i64, tpu.core_type = #tpu.core_type<tc>, window_params = [{transform_indices = @transform_0, window_bounds = array<i64: 8, 256>}, {pipeline_mode = #tpu.pipeline_mode<synchronous>, transform_indices = @transform_1, window_bounds = array<i64: 256, 1024>}, {pipeline_mode = #tpu.pipeline_mode<synchronous>, transform_indices = @transform_2, window_bounds = array<i64: 1024, 256>}, {transform_indices = @transform_3, window_bounds = array<i64: 8, 256>}]} {
    %c0 = arith.constant 0 : index
    %c0_0 = arith.constant 0 : index
    %0 = vector.load %arg1[%c0, %c0_0] : memref<8x256xf32, #tpu.memory_space<vmem>>, vector<8x256xf32>
    %1 = arith.mulf %0, %0 : vector<8x256xf32>
    %cst = arith.constant dense<0.000000e+00> : vector<8xf32>
    %2 = vector.multi_reduction <add>, %1, %cst [1] : vector<8x256xf32> to vector<8xf32>
    %3 = vector.shape_cast %2 : vector<8xf32> to vector<8x1xf32>
    %cst_1 = arith.constant 2.560000e+02 : f32
    %4 = vector.broadcast %cst_1 : f32 to vector<8x1xf32>
    %5 = arith.divf %3, %4 : vector<8x1xf32>
    %cst_2 = arith.constant 9.99999997E-7 : f32
    %6 = vector.broadcast %cst_2 : f32 to vector<8x1xf32>
    %7 = arith.addf %5, %6 : vector<8x1xf32>
    %8 = math.rsqrt %7 : vector<8x1xf32>
    %9 = vector.broadcast %8 : vector<8x1xf32> to vector<8x256xf32>
    %10 = arith.mulf %0, %9 : vector<8x256xf32>
    %11 = arith.truncf %10 : vector<8x256xf32> to vector<8x256xbf16>
    %c0_3 = arith.constant 0 : index
    %c0_4 = arith.constant 0 : index
    %12 = vector.load %arg2[%c0_3, %c0_4] : memref<256x1024xbf16, #tpu.memory_space<vmem>>, vector<256x1024xbf16>
    %cst_5 = arith.constant dense<0.000000e+00> : vector<8x1024xf32>
    %13 = tpu.matmul %11, %12, %cst_5 {dimension_numbers = #tpu.dot_dimension_numbers<[1], [0], [0], [1], [0, 0, 1, 1], [], []>} : vector<8x256xbf16>, vector<256x1024xbf16>, vector<8x1024xf32> -> vector<8x1024xf32>
    %cst_6 = arith.constant 0.000000e+00 : f32
    %14 = vector.broadcast %cst_6 : f32 to vector<8x1024xf32>
    %15 = arith.maximumf %13, %14 : vector<8x1024xf32>
    %16 = arith.truncf %15 : vector<8x1024xf32> to vector<8x1024xbf16>
    %c0_7 = arith.constant 0 : index
    %c0_8 = arith.constant 0 : index
    %17 = vector.load %arg3[%c0_7, %c0_8] : memref<1024x256xbf16, #tpu.memory_space<vmem>>, vector<1024x256xbf16>
    %cst_9 = arith.constant dense<0.000000e+00> : vector<8x256xf32>
    %18 = tpu.matmul %16, %17, %cst_9 {dimension_numbers = #tpu.dot_dimension_numbers<[1], [0], [0], [1], [0, 0, 1, 1], [], []>} : vector<8x1024xbf16>, vector<1024x256xbf16>, vector<8x256xf32> -> vector<8x256xf32>
    %c0_10 = arith.constant 0 : index
    %c0_11 = arith.constant 0 : index
    %19 = vector.load %arg1[%c0_10, %c0_11] : memref<8x256xf32, #tpu.memory_space<vmem>>, vector<8x256xf32>
    %20 = arith.addf %19, %18 : vector<8x256xf32>
    %c0_12 = arith.constant 0 : index
    %c0_13 = arith.constant 0 : index
    %21 = vector.load %arg4[%c0_12, %c0_13] : memref<8x256xf32, #tpu.memory_space<vmem>>, vector<8x256xf32>
    tpu.vector_store %arg4[%c0_12, %c0_13], %20 {strides = array<i32>} : memref<8x256xf32, #tpu.memory_space<vmem>>, vector<8x256xf32>,
    return
  }
  func.func @transform_0(%arg0: i32) -> (i32, i32) {
    %c0_i32 = arith.constant 0 : i32
    %c0_i32_0 = arith.constant 0 : i32
    return %arg0, %c0_i32 : i32, i32
  }
  func.func @transform_1(%arg0: i32) -> (i32, i32) {
    %c0_i32 = arith.constant 0 : i32
    %c0_i32_0 = arith.constant 0 : i32
    %c0_i32_1 = arith.constant 0 : i32
    return %c0_i32, %c0_i32_0 : i32, i32
  }
  func.func @transform_2(%arg0: i32) -> (i32, i32) {
    %c0_i32 = arith.constant 0 : i32
    %c0_i32_0 = arith.constant 0 : i32
    %c0_i32_1 = arith.constant 0 : i32
    return %c0_i32, %c0_i32_0 : i32, i32
  }
  func.func @transform_3(%arg0: i32) -> (i32, i32) {
    %c0_i32 = arith.constant 0 : i32
    %c0_i32_0 = arith.constant 0 : i32
    return %arg0, %c0_i32 : i32, i32
  }
}

module attributes {stable_mosaic.version = 11 : i64} {
  func.func @_ffn_kernel(%arg0: i32, %arg1: memref<8x256xf32, #tpu.memory_space<vmem>>, %arg2: memref<256x1024xbf16, #tpu.memory_space<vmem>>, %arg3: memref<1024x256xbf16, #tpu.memory_space<vmem>>, %arg4: memref<8x256xf32, #tpu.memory_space<vmem>>) attributes {dimension_semantics = [#tpu.dimension_semantics<parallel>], iteration_bounds = array<i64: 2>, scalar_prefetch = 0 : i64, scratch_operands = 0 : i64, tpu.core_type = #tpu.core_type<tc>, window_params = [{transform_indices = @transform_0, window_bounds = array<i64: 8, 256>}, {pipeline_mode = #tpu.pipeline_mode<synchronous>, transform_indices = @transform_1, window_bounds = array<i64: 256, 1024>}, {pipeline_mode = #tpu.pipeline_mode<synchronous>, transform_indices = @transform_2, window_bounds = array<i64: 1024, 256>}, {transform_indices = @transform_3, window_bounds = array<i64: 8, 256>}]} {
    %c0 = arith.constant 0 : index
    %c0_0 = arith.constant 0 : index
    %0 = vector.load %arg1[%c0, %c0_0] : memref<8x256xf32, #tpu.memory_space<vmem>>, vector<8x256xf32>
    %1 = arith.mulf %0, %0 : vector<8x256xf32>
    %cst = arith.constant dense<0.000000e+00> : vector<8xf32>
    %2 = vector.multi_reduction <add>, %1, %cst [1] : vector<8x256xf32> to vector<8xf32>
    %3 = vector.shape_cast %2 : vector<8xf32> to vector<8x1xf32>
    %cst_1 = arith.constant 2.560000e+02 : f32
    %4 = vector.broadcast %cst_1 : f32 to vector<8x1xf32>
    %5 = arith.divf %3, %4 : vector<8x1xf32>
    %cst_2 = arith.constant 9.99999997E-7 : f32
    %6 = vector.broadcast %cst_2 : f32 to vector<8x1xf32>
    %7 = arith.addf %5, %6 : vector<8x1xf32>
    %8 = math.rsqrt %7 : vector<8x1xf32>
    %9 = vector.broadcast %8 : vector<8x1xf32> to vector<8x256xf32>
    %10 = arith.mulf %0, %9 : vector<8x256xf32>
    %11 = arith.truncf %10 : vector<8x256xf32> to vector<8x256xbf16>
    %c0_3 = arith.constant 0 : index
    %c0_4 = arith.constant 0 : index
    %12 = vector.load %arg2[%c0_3, %c0_4] : memref<256x1024xbf16, #tpu.memory_space<vmem>>, vector<256x1024xbf16>
    %cst_5 = arith.constant dense<0.000000e+00> : vector<8x1024xf32>
    %13 = tpu.matmul %11, %12, %cst_5 {dimension_numbers = #tpu.dot_dimension_numbers<[1], [0], [0], [1], [0, 0, 1, 1], [], []>} : vector<8x256xbf16>, vector<256x1024xbf16>, vector<8x1024xf32> -> vector<8x1024xf32>
    %cst_6 = arith.constant 0.000000e+00 : f32
    %14 = vector.broadcast %cst_6 : f32 to vector<8x1024xf32>
    %15 = arith.maximumf %13, %14 : vector<8x1024xf32>
    %16 = arith.truncf %15 : vector<8x1024xf32> to vector<8x1024xbf16>
    %c0_7 = arith.constant 0 : index
    %c0_8 = arith.constant 0 : index
    %17 = vector.load %arg3[%c0_7, %c0_8] : memref<1024x256xbf16, #tpu.memory_space<vmem>>, vector<1024x256xbf16>
    %cst_9 = arith.constant dense<0.000000e+00> : vector<8x256xf32>
    %18 = tpu.matmul %16, %17, %cst_9 {dimension_numbers = #tpu.dot_dimension_numbers<[1], [0], [0], [1], [0, 0, 1, 1], [], []>} : vector<8x1024xbf16>, vector<1024x256xbf16>, vector<8x256xf32> -> vector<8x256xf32>
    %c0_10 = arith.constant 0 : index
    %c0_11 = arith.constant 0 : index
    %19 = vector.load %arg1[%c0_10, %c0_11] : memref<8x256xf32, #tpu.memory_space<vmem>>, vector<8x256xf32>
    %20 = arith.addf %19, %18 : vector<8x256xf32>
    %c0_12 = arith.constant 0 : index
    %c0_13 = arith.constant 0 : index
    %21 = vector.load %arg4[%c0_12, %c0_13] : memref<8x256xf32, #tpu.memory_space<vmem>>, vector<8x256xf32>
    tpu.vector_store %arg4[%c0_12, %c0_13], %20 {strides = array<i32>} : memref<8x256xf32, #tpu.memory_space<vmem>>, vector<8x256xf32>,
    return
  }
  func.func @transform_0(%arg0: i32) -> (i32, i32) {
    %c0_i32 = arith.constant 0 : i32
    %c0_i32_0 = arith.constant 0 : i32
    return %arg0, %c0_i32 : i32, i32
  }
  func.func @transform_1(%arg0: i32) -> (i32, i32) {
    %c0_i32 = arith.constant 0 : i32
    %c0_i32_0 = arith.constant 0 : i32
    %c0_i32_1 = arith.constant 0 : i32
    return %c0_i32, %c0_i32_0 : i32, i32
  }
  func.func @transform_2(%arg0: i32) -> (i32, i32) {
    %c0_i32 = arith.constant 0 : i32
    %c0_i32_0 = arith.constant 0 : i32
    %c0_i32_1 = arith.constant 0 : i32
    return %c0_i32, %c0_i32_0 : i32, i32
  }
  func.func @transform_3(%arg0: i32) -> (i32, i32) {
    %c0_i32 = arith.constant 0 : i32
    %c0_i32_0 = arith.constant 0 : i32
    return %arg0, %c0_i32 : i32, i32
  }
}

</mosaic_0001>

<bundles_post_ra>
// kernel: tpu_custom_call.1
= control target key start
LH: loop header
LB: loop body
LE: loop exit
PB: predicated region body
PF: predicated region fallthrough
CT: control target
= control target key end

     0   :  { %8 = vsyncpa [#allocation3], 0  ;;  %s3225_s0 = inlined_call_operand.hbm [shape: f32[16,256], index: 0, kind: input, shape index: {}]   ;;  %s3226_s1 = inlined_call_operand.hbm [shape: bf16[256,1024], index: 1, kind: input, shape index: {}]   ;;  %s3227_s2 = inlined_call_operand.hbm [shape: bf16[1024,256], index: 2, kind: input, shape index: {}]   ;;  %s3228_s3 = inlined_call_operand.hbm [shape: f32[16,256], index: 3, kind: output, shape index: {}]  }
   0x1   :  { %10 = vsyncpa [#allocation3 + $0x1], 0 }
   0x2   :  { %11 = vsyncpa [#allocation6], 0 }
   0x3   :  { %12 = vsyncpa [#allocation4], 0 }
   0x4   :  { %14 = vsyncpa [#allocation4 + $0x1], 0  ;;  %s2948_s12 = smov 0   ;;  %s2950_s13 = smov 0  }
   0x5   :  { %s2952_s14 = smov 0   ;;  %s2954_s15 = smov 0  }
   0x6 LB: > { %s2969_s16 = sadd.s32 4294967295, %s2918_s15   ;;  %s2219_s17 = sadd.s32 4294967294, %s2918_s15   ;;  %s2918_s15 = sphi %s2954_s15, %s3248_s15   ;;  %s2914_s14 = sphi %s2952_s14, %s3247_s14   ;;  %s2910_s13 = sphi %s2950_s13, %s3246_s13   ;;  %s2906_s12 = sphi %s2948_s12, %s3245_s12  }
   0x7   : > { %p40_p0 = scmp.ne.s32.totalorder %s2910_s13, %s2906_s12  ;;  %p3229_p1 = scmp.eq.s32.totalorder %s2969_s16, 0 }
   0x8   : > { %p112_p3 = scmp.eq.s32.totalorder %s2219_s17, 1  ;;  %p2220_p5 = scmp.ge.s32.totalorder %s2918_s15, 1 }
   0x9   : > { %p2978_p4 = por %p3229_p1, %p40_p0  ;;  %p119_p7 = scmp.lt.s32.totalorder %s2918_s15, 3 }
   0xa   : > { %p2983_p6 = por %p112_p3, %p40_p0  ;;  %s2920_s21 = smov [#allocation5]  }
   0xb   : > { %s3232_s18 = scalar_select %p2978_p4, 1, 0 }
   0xc   : > { %s3233_s19 = scalar_select %p2983_p6, 1, 0 }
   0xd   : > { %p2988_p8 = pnand %p2220_p5, %p119_p7  ;;  %s131_s22 = sshll.u32 %s2920_s21, 4  ;;  %s2992_s22 = int_to_ptr.vmem [resolvable:$true] %s131_s22 }
   0xe   : > { %s2921_s24 = smov [#allocation7]   ;;  %s2762_s28 = scalar_lea.hbm %s3226_s1, 16384 }
   0xf   : > { %p2507_p9 = pneg %p2988_p8  ;;  %s144_s25 = sshll.u32 %s2921_s24, 4  ;;  %s3003_s25 = int_to_ptr.vmem [resolvable:$true] %s144_s25 }
  0x10   : > { %p2763_p12 = scmp.ne.s32.totalorder %s3226_s1, %s2762_s28  ;;  %p2769_p5 = scmp.lt.u32.totalorder %s2762_s28, %s3226_s1 }
  0x11   : > { %p2999_p11 = pnand %p2507_p9, %p3229_p1 }
  0x13   : > { %p2764_p13 = pneg %p2999_p11 }
  0x15   : > { %p2765_p0 = pnand %p2764_p13, %p2763_p12 }
  0x17   : > { %p2766_p3 = pneg %p2765_p0 }
  0x19   : > { %p2771_p7 = pnand %p2769_p5, %p2766_p3 }
  0x1b   : > { %2774 = shalt.err (!%p2771_p7)
}
  0x1c   : > { %s2775_s6 = scalar_lea.vmem %s2992_s22, 16384  ;;  %p2783_p2 = scmp.lt.s32.totalorder %s2992_s22, %s2992_s22 }
  0x1d   : > { %p2776_p9 = scmp.ne.s32.totalorder %s2992_s22, %s2775_s6  ;;  %p2784_p12 = scmp.lt.s32.totalorder %s2775_s6, %s2775_s6 }
  0x1f   : > { %p2778_p10 = pnand %p2776_p9, %p2764_p13  ;;  %p2785_p0 = por %p2784_p12, %p2783_p2 }
  0x21   : > { %p2779_p1 = pneg %p2778_p10 }
  0x23   : > { %p2786_p6 = pnand %p2785_p0, %p2779_p1 }
  0x25   : > { %2789 = shalt.err (!%p2786_p6)
}
  0x26   : > { %s2922_s7 = smov 512   ;;  %s2923_s8 = smov 32  }
  0x27   : > { %2510 = dma.hbm_to_vmem [thread:$0]  (!%p2999_p11), %s3226_s1, 16384, %s2992_s22, [#allocation6], %s2922_s7, %s2922_s7, %s2923_s8  }
  0x28   : > { %s2790_s21 = scalar_lea.hbm %s3227_s2, 16384 }
  0x29   : > { %p2791_p2 = scmp.ne.s32.totalorder %s3227_s2, %s2790_s21  ;;  %p2797_p10 = scmp.lt.u32.totalorder %s2790_s21, %s3227_s2 }
  0x2b   : > { %p2793_p1 = pnand %p2791_p2, %p2764_p13 }
  0x2d   : > { %p2794_p6 = pneg %p2793_p1 }
  0x2f   : > { %p2799_p3 = pnand %p2797_p10, %p2794_p6 }
  0x31   : > { %2802 = shalt.err (!%p2799_p3)
}
  0x32   : > { %s2803_s22 = scalar_lea.vmem %s3003_s25, 16384  ;;  %p2811_p12 = scmp.lt.s32.totalorder %s3003_s25, %s3003_s25 }
  0x33   : > { %p2804_p5 = scmp.ne.s32.totalorder %s3003_s25, %s2803_s22  ;;  %p2812_p0 = scmp.lt.s32.totalorder %s2803_s22, %s2803_s22 }
  0x35   : > { %p2806_p7 = pnand %p2804_p5, %p2764_p13  ;;  %p2813_p2 = por %p2812_p0, %p2811_p12 }
  0x37   : > { %p2807_p9 = pneg %p2806_p7 }
  0x39   : > { %p2814_p1 = pnand %p2813_p2, %p2807_p9 }
  0x3b   : > { %2817 = shalt.err (!%p2814_p1)
}
  0x3c   : > { %s2924_s29 = smov 128   ;;  %s2925_s30 = smov 8  }
  0x3d   : > { %2513 = dma.hbm_to_vmem [thread:$0]  (!%p2999_p11), %s3227_s2, 16384, %s3003_s25, [#allocation6], %s2924_s29, %s2924_s29, %s2925_s30  }
  0x3e   : > { %s3058_s6 = sadd.s32 1, %s2918_s15   ;;  %s27_s8 = sadd.s32 1, %s2914_s14 }
  0x3f   : > { %s24_s7 = ssub.s32 %s2918_s15, %s3058_s6  ;;  %p34_p6 = scmp.ne.s32.totalorder %s2914_s14, %s2910_s13 }
  0x40   : > { %p25_p13 = scmp.eq.s32.totalorder %s24_s7, 0  ;;  %p35_p10 = scmp.eq.s32.totalorder %s2918_s15, 0 }
  0x41   : > { %p3236_p5 = scmp.eq.s32.totalorder %s2969_s16, 1  ;;  %p2524_p9 = scmp.lt.s32.totalorder %s2918_s15, 2 }
  0x42   : > { %s3067_s9 = scalar_select %p25_p13, %s2914_s14, %s27_s8  }
  0x43   : > { %p36_p3 = por %p35_p10, %p34_p6  ;;  %p3071_p7 = por %p3236_p5, %p34_p6 }
  0x44   : > { %s158_s23 = sand.u32 1, %s2914_s14   ;;  %s2493_s25 = sshll.u32 %s2918_s15, 8 }
  0x45   : > { %s3237_s10 = scalar_select %p3071_p7, 1, 0 }
  0x46   : > { %s2224_s11 = sshll.u32 %s158_s23, 4  ;;  %s3081_s24 = scalar_lea.hbm %s3225_s0, %s2493_s25 }
  0x47   : > { %s162_s26 = scalar_lea.vmem [#allocation2], %s2224_s11  ;;  %p3085_p11 = pnand %p2524_p9, %p36_p3 }
  0x48   : > { %s170_s27 = sshll.u32 %s162_s26, 4  ;;  %s159_s22 = scalar_lea.sflag [#allocation3], %s158_s23  ;;  %s3083_s27 = int_to_ptr.vmem [resolvable:$true] %s170_s27 }
  0x49   : > { %s2818_s29 = scalar_lea.hbm %s3081_s24, 256  ;;  %p2820_p0 = pneg %p3085_p11 }
  0x4a   : > { %p2819_p12 = scmp.ne.s32.totalorder %s3081_s24, %s2818_s29  ;;  %s2823_s5 = scalar_lea.hbm %s3225_s0, 512 }
  0x4b   : > { %p2824_p13 = scmp.lt.u32.totalorder %s3081_s24, %s3225_s0  ;;  %p2825_p6 = scmp.lt.u32.totalorder %s2823_s5, %s2818_s29 }
  0x4c   : > { %p2821_p2 = pnand %p2820_p0, %p2819_p12  ;;  %p2827_p3 = scmp.lt.u32.totalorder %s2818_s29, %s3081_s24 }
  0x4d   : > { %p2826_p10 = por %p2825_p6, %p2824_p13 }
  0x4e   : > { %p2822_p1 = pneg %p2821_p2 }
  0x4f   : > { %p2828_p5 = por %p2827_p3, %p2826_p10 }
  0x51   : > { %p2829_p9 = pnand %p2828_p5, %p2822_p1 }
  0x53   : > { %2832 = shalt.err (!%p2829_p9)
}
  0x54   : > { %s2833_s23 = scalar_lea.vmem %s3083_s27, 256  ;;  %s2926_s11 = smov [#allocation2]  }
  0x55   : > { %p2834_p12 = scmp.ne.s32.totalorder %s3083_s27, %s2833_s23  ;;  %s2838_s25 = sshll.u32 %s2926_s11, 4  ;;  %s2839_s25 = int_to_ptr.vmem [resolvable:$false] %s2838_s25 }
  0x56   : > { %s2840_s17 = scalar_lea.vmem %s2839_s25, 512  ;;  %p2841_p4 = scmp.lt.s32.totalorder %s3083_s27, %s2839_s25 }
  0x57   : > { %p2836_p2 = pnand %p2834_p12, %p2820_p0  ;;  %p2842_p13 = scmp.lt.s32.totalorder %s2840_s17, %s2833_s23 }
  0x59   : > { %p2837_p7 = pneg %p2836_p2  ;;  %p2843_p6 = por %p2842_p13, %p2841_p4 }
  0x5b   : > { %p2844_p10 = pnand %p2843_p6, %p2837_p7 }
  0x5d   : > { %2847 = shalt.err (!%p2844_p10)
}
  0x5e   : > { %2517 = dma.hbm_to_vmem [thread:$0]  (!%p3085_p11), %s3081_s24, 256, %s3083_s27, %s159_s22  }
  0x5f   : > { %179 = sbr.rel (%p2988_p8) target bundleno = 789 (0x315), region = 32  ;;  %s3117_s21 = sand.u32 (!%p2988_p8), 1, %s2910_s13  }
  0x60   : > { %s2228_s26 = sshll.u32 (!%p2988_p8), %s3117_s21, 4  ;;  %s182_s29 = scalar_lea.sflag (!%p2988_p8), [#allocation3], %s3117_s21 }
  0x61   : > { %s3123_s30 = scalar_lea.vmem (!%p2988_p8), [#allocation2], %s2228_s26  ;;  %p3239_p4 = scmp.ne.s32.totalorder (!%p2988_p8), %s3232_s18, 0 }
  0x66   : > { %2893 = dma.done.wait (%p3239_p4), %s182_s29, 256  }
  0x67   : > { %2895 = vsyncadd (%p3239_p4), %s182_s29, 4294967040  ;;  %p3240_p7 = scmp.eq.s32.totalorder %s2969_s16, 0 }
  0x69   : > { %2897 = dma.done.wait (%p3240_p7), [#allocation6], 32768   ;;  %p3241_p8 = pmov %p3240_p7 }
  0x6a   : > { %v3134_v0 = vld [vmem:[%s3123_s30] sm:$0xff]  ;;  %v3137_v1 = vld [vmem:[%s3123_s30 + $0x8] sm:$0xff]  ;;  %s2494_s18 = sshll.u32 %s2969_s16, 8  ;;  %s215_s20 = scalar_lea.vmem [#allocation8], %s2228_s26 }
  0x6b   : > { %2899 = vsyncadd (%p3241_p8), [#allocation6], 4294934528  ;;  %v231_v2 = vld [vmem:[#allocation5] sm:$0xff]  ;;  %v218_v3 = vmul.f32 %v3134_v0, %v3134_v0  ;;  %v219_v4 = vmul.f32 %v3137_v1, %v3137_v1  ;;  %v232_v6 = vld [vmem:[#allocation5 + $0x8] sm:$0xff]  ;;  %s2130_s24 = sshll.u32 %s215_s20, 4  ;;  %s3181_s22 = scalar_lea.hbm %s3228_s3, %s2494_s18  ;;  %s3183_s24 = int_to_ptr.vmem [resolvable:$true] %s2130_s24 }
  0x6c   : > { %v235_v5 = vld [vmem:[#allocation5 + $0x20] sm:$0xff]  ;;  %v236_v7 = vld [vmem:[#allocation5 + $0x28] sm:$0xff]  ;;  %s2116_s16 = scalar_lea.sflag [#allocation4], %s3117_s21  ;;  %s2848_s4 = scalar_lea.vmem %s3183_s24, 256 }
  0x6d   : > { %v2233_v8 = vcombine.high %v231_v2, %v235_v5  ;;  %v2235_v9 = vcombine.high %v232_v6, %v236_v7  ;;  %v2232_v10 = vcombine.low %v231_v2, %v235_v5  ;;  %v2234_v11 = vcombine.low %v232_v6, %v236_v7  ;;  %v239_v12 = vld [vmem:[#allocation5 + $0x40] sm:$0xff]  ;;  %v240_v14 = vld [vmem:[#allocation5 + $0x48] sm:$0xff]  ;;  %p2849_p11 = scmp.ne.s32.totalorder %s3183_s24, %s2848_s4  ;;  %p3242_p0 = scmp.ne.s32.totalorder %s3237_s10, 0 }
  0x6e   : > { %v243_v13 = vld [vmem:[#allocation5 + $0x60] sm:$0xff]  ;;  %v220_v15 = vadd.f32 %v219_v4, %v218_v3  ;;  %v244_v17 = vld [vmem:[#allocation5 + $0x68] sm:$0xff]  ;;  %s2927_s5 = smov [#allocation8]  }
  0x6f   : > { %v2241_v16 = vcombine.high %v239_v12, %v243_v13  ;;  %v247_v18 = vld [vmem:[#allocation5 + $0x80] sm:$0xff]  ;;  %999 = vmatprep.subr.bf16.mxu0 %v2233_v8  ;;  %1040 = vmatprep.subr.bf16.mxu1 %v2235_v9  ;;  %v2243_v20 = vcombine.high %v240_v14, %v244_v17  ;;  %v248_v21 = vld [vmem:[#allocation5 + $0x88] sm:$0xff]  ;;  %v2240_v23 = vcombine.low %v239_v12, %v243_v13  ;;  %p2850_p1 = pnand %p2849_p11, %p3242_p0  ;;  %s2852_s7 = sshll.u32 %s2927_s5, 4  ;;  %s2853_s7 = int_to_ptr.vmem [resolvable:$false] %s2852_s7 }
  0x70   : > { %v251_v19 = vld [vmem:[#allocation5 + $0xa0] sm:$0xff]  ;;  %v252_v22 = vld [vmem:[#allocation5 + $0xa8] sm:$0xff]  ;;  %221 = vadd.xlane.f32.xlu0 %v220_v15  ;;  %1000 = vmatpush1.bf16.msra.mxu0 %v2232_v10  ;;  %v2242_v24 = vcombine.low %v240_v14, %v244_v17  ;;  %s2854_s8 = scalar_lea.vmem %s2853_s7, 512  ;;  %p2855_p5 = scmp.lt.s32.totalorder %s3183_s24, %s2853_s7 }
  0x71   : > { %1041 = vmatpush1.bf16.msra.mxu1 %v2234_v11  ;;  %1001 = vmatprep.subr.bf16.mxu0 %v2241_v16  ;;  %v2249_v25 = vcombine.high %v247_v18, %v251_v19  ;;  %v2251_v26 = vcombine.high %v248_v21, %v252_v22  ;;  %v255_v27 = vld [vmem:[#allocation5 + $0xc0] sm:$0xff]  ;;  %v256_v29 = vld [vmem:[#allocation5 + $0xc8] sm:$0xff]  ;;  %v2248_v31 = vcombine.low %v247_v18, %v251_v19  ;;  %p2851_p3 = pneg %p2850_p1  ;;  %p2856_p9 = scmp.lt.s32.totalorder %s2854_s8, %s2848_s4 }
  0x72   : > { %1042 = vmatprep.subr.bf16.mxu1 %v2243_v20  ;;  %v259_v28 = vld [vmem:[#allocation5 + $0xe0] sm:$0xff]  ;;  %v260_v30 = vld [vmem:[#allocation5 + $0xe8] sm:$0xff]  ;;  %v2250_v32 = vcombine.low %v248_v21, %v252_v22 }
  0x73   : > { %v2257_v33 = vcombine.high %v255_v27, %v259_v28  ;;  %v2259_v34 = vcombine.high %v256_v29, %v260_v30  ;;  %v263_v35 = vld [vmem:[#allocation5 + $0x100] sm:$0xff]  ;;  %v264_v37 = vld [vmem:[#allocation5 + $0x108] sm:$0xff]  ;;  %v2256_v39 = vcombine.low %v255_v27, %v259_v28  ;;  %v2258_v40 = vcombine.low %v256_v29, %v260_v30  ;;  %v3147_v27 = vld [vmem:[#allocation5 + $0x18] sm:$0xff]  ;;  %p2857_p12 = por %p2856_p9, %p2855_p5 }
  0x74   : > { %1002 = vmatpush1.bf16.msra.mxu0 %v2240_v23  ;;  %v267_v36 = vld [vmem:[#allocation5 + $0x120] sm:$0xff]  ;;  %v268_v38 = vld [vmem:[#allocation5 + $0x128] sm:$0xff]  ;;  %v3149_v28 = vld [vmem:[#allocation5 + $0x38] sm:$0xff] }
  0x75   : > { %1043 = vmatpush1.bf16.msra.mxu1 %v2242_v24  ;;  %1003 = vmatprep.subr.bf16.mxu0 %v2249_v25  ;;  %v2265_v41 = vcombine.high %v263_v35, %v267_v36  ;;  %v2267_v42 = vcombine.high %v264_v37, %v268_v38  ;;  %v271_v43 = vld [vmem:[#allocation5 + $0x140] sm:$0xff]  ;;  %v272_v45 = vld [vmem:[#allocation5 + $0x148] sm:$0xff]  ;;  %v2264_v47 = vcombine.low %v263_v35, %v267_v36  ;;  %v3143_v25 = vld [vmem:[#allocation5 + $0x10] sm:$0xff]  ;;  %p2858_p2 = pnand %p2857_p12, %p2851_p3 }
  0x76   : > { %1044 = vmatprep.subr.bf16.mxu1 %v2251_v26  ;;  %v275_v44 = vld [vmem:[#allocation5 + $0x160] sm:$0xff]  ;;  %v276_v46 = vld [vmem:[#allocation5 + $0x168] sm:$0xff]  ;;  %v2266_v48 = vcombine.low %v264_v37, %v268_v38  ;;  %v3145_v26 = vld [vmem:[#allocation5 + $0x30] sm:$0xff] }
  0x77   : > { %v2273_v49 = vcombine.high %v271_v43, %v275_v44  ;;  %v2275_v50 = vcombine.high %v272_v45, %v276_v46  ;;  %v279_v51 = vld [vmem:[#allocation5 + $0x180] sm:$0xff]  ;;  %v280_v53 = vld [vmem:[#allocation5 + $0x188] sm:$0xff]  ;;  %v2272_v55 = vcombine.low %v271_v43, %v275_v44  ;;  %v2274_v56 = vcombine.low %v272_v45, %v276_v46 }
  0x78   : > { %1004 = vmatpush1.bf16.msra.mxu0 %v2248_v31  ;;  %v283_v52 = vld [vmem:[#allocation5 + $0x1a0] sm:$0xff]  ;;  %v284_v54 = vld [vmem:[#allocation5 + $0x1a8] sm:$0xff] }
  0x79   : > { %1045 = vmatpush1.bf16.msra.mxu1 %v2250_v32  ;;  %1005 = vmatprep.subr.bf16.mxu0 %v2257_v33  ;;  %v2281_v57 = vcombine.high %v279_v51, %v283_v52  ;;  %v2283_v58 = vcombine.high %v280_v53, %v284_v54  ;;  %v287_v59 = vld [vmem:[#allocation5 + $0x1c0] sm:$0xff]  ;;  %v288_v61 = vld [vmem:[#allocation5 + $0x1c8] sm:$0xff]  ;;  %v2280_v63 = vcombine.low %v279_v51, %v283_v52 }
  0x7a   : > { %1046 = vmatprep.subr.bf16.mxu1 %v2259_v34  ;;  %v291_v60 = vld [vmem:[#allocation5 + $0x1e0] sm:$0xff]  ;;  %v292_v62 = vld [vmem:[#allocation5 + $0x1e8] sm:$0xff]  ;;  %v2282_v3 = vcombine.low %v280_v53, %v284_v54  ;;  %v2236_v32 = vcombine.low %v3143_v25, %v3145_v26  ;;  %v2238_v33 = vcombine.low %v3147_v27, %v3149_v28 }
  0x7b   : > { %v295_v2 = vld [vmem:[#allocation5 + $0x200] sm:$0xff]  ;;  %v2289_v4 = vcombine.high %v287_v59, %v291_v60  ;;  %v296_v6 = vld [vmem:[#allocation5 + $0x208] sm:$0xff]  ;;  %v2291_v8 = vcombine.high %v288_v61, %v292_v62  ;;  %v2288_v9 = vcombine.low %v287_v59, %v291_v60  ;;  %v2290_v12 = vcombine.low %v288_v61, %v292_v62 }
  0x7c   : > { %1006 = vmatpush1.bf16.msra.mxu0 %v2256_v39  ;;  %v299_v5 = vld [vmem:[#allocation5 + $0x220] sm:$0xff]  ;;  %v300_v7 = vld [vmem:[#allocation5 + $0x228] sm:$0xff] }
  0x7d   : > { %1047 = vmatpush1.bf16.msra.mxu1 %v2258_v40  ;;  %1007 = vmatprep.subr.bf16.mxu0 %v2265_v41  ;;  %v303_v10 = vld [vmem:[#allocation5 + $0x240] sm:$0xff]  ;;  %v2297_v13 = vcombine.high %v295_v2, %v299_v5  ;;  %v304_v14 = vld [vmem:[#allocation5 + $0x248] sm:$0xff]  ;;  %v2299_v16 = vcombine.high %v296_v6, %v300_v7  ;;  %v2296_v17 = vcombine.low %v295_v2, %v299_v5 }
  0x7e   : > { %1048 = vmatprep.subr.bf16.mxu1 %v2267_v42  ;;  %v307_v11 = vld [vmem:[#allocation5 + $0x260] sm:$0xff]  ;;  %v308_v15 = vld [vmem:[#allocation5 + $0x268] sm:$0xff]  ;;  %v2298_v20 = vcombine.low %v296_v6, %v300_v7 }
  0x7f   : > { %v311_v18 = vld [vmem:[#allocation5 + $0x280] sm:$0xff]  ;;  %v2305_v21 = vcombine.high %v303_v10, %v307_v11  ;;  %v312_v22 = vld [vmem:[#allocation5 + $0x288] sm:$0xff]  ;;  %v2307_v24 = vcombine.high %v304_v14, %v308_v15  ;;  %v2304_v29 = vcombine.low %v303_v10, %v307_v11  ;;  %v2306_v34 = vcombine.low %v304_v14, %v308_v15 }
  0x80   : > { %1008 = vmatpush1.bf16.msra.mxu0 %v2264_v47  ;;  %v315_v19 = vld [vmem:[#allocation5 + $0x2a0] sm:$0xff]  ;;  %v316_v23 = vld [vmem:[#allocation5 + $0x2a8] sm:$0xff]  ;;  %v2237_v15 = vcombine.high %v3143_v25, %v3145_v26 }
  0x81   : > { %1049 = vmatpush1.bf16.msra.mxu1 %v2266_v48  ;;  %1009 = vmatprep.subr.bf16.mxu0 %v2273_v49  ;;  %v319_v30 = vld [vmem:[#allocation5 + $0x2c0] sm:$0xff]  ;;  %v2313_v35 = vcombine.high %v311_v18, %v315_v19  ;;  %v2315_v36 = vcombine.high %v312_v22, %v316_v23  ;;  %v320_v37 = vld [vmem:[#allocation5 + $0x2c8] sm:$0xff]  ;;  %v2312_v39 = vcombine.low %v311_v18, %v315_v19 }
  0x82   : > { %1050 = vmatprep.subr.bf16.mxu1 %v2275_v50  ;;  %v323_v31 = vld [vmem:[#allocation5 + $0x2e0] sm:$0xff]  ;;  %v324_v38 = vld [vmem:[#allocation5 + $0x2e8] sm:$0xff]  ;;  %v2314_v42 = vcombine.low %v312_v22, %v316_v23  ;;  %v241_v23 = vld [vmem:[#allocation5 + $0x50] sm:$0xff] }
  0x83   : > { %v327_v40 = vld [vmem:[#allocation5 + $0x300] sm:$0xff]  ;;  %v2321_v43 = vcombine.high %v319_v30, %v323_v31  ;;  %v2323_v44 = vcombine.high %v320_v37, %v324_v38  ;;  %v328_v45 = vld [vmem:[#allocation5 + $0x308] sm:$0xff]  ;;  %v2320_v47 = vcombine.low %v319_v30, %v323_v31  ;;  %v2322_v50 = vcombine.low %v320_v37, %v324_v38  ;;  %v246_v30 = vld [vmem:[#allocation5 + $0x78] sm:$0xff] }
  0x84   : > { %1010 = vmatpush1.bf16.msra.mxu0 %v2272_v55  ;;  %v331_v41 = vld [vmem:[#allocation5 + $0x320] sm:$0xff]  ;;  %v332_v46 = vld [vmem:[#allocation5 + $0x328] sm:$0xff]  ;;  %v253_v38 = vld [vmem:[#allocation5 + $0xb0] sm:$0xff] }
  0x85   : > { %1051 = vmatpush1.bf16.msra.mxu1 %v2274_v56  ;;  %1011 = vmatprep.subr.bf16.mxu0 %v2281_v57  ;;  %v335_v48 = vld [vmem:[#allocation5 + $0x340] sm:$0xff]  ;;  %v2329_v51 = vcombine.high %v327_v40, %v331_v41  ;;  %v2331_v52 = vcombine.high %v328_v45, %v332_v46  ;;  %v336_v53 = vld [vmem:[#allocation5 + $0x348] sm:$0xff]  ;;  %v2328_v55 = vcombine.low %v327_v40, %v331_v41  ;;  %v254_v40 = vld [vmem:[#allocation5 + $0xb8] sm:$0xff] }
  0x86   : > { %1052 = vmatprep.subr.bf16.mxu1 %v2283_v58  ;;  %v339_v49 = vld [vmem:[#allocation5 + $0x360] sm:$0xff]  ;;  %v340_v54 = vld [vmem:[#allocation5 + $0x368] sm:$0xff]  ;;  %v2330_v58 = vcombine.low %v328_v45, %v332_v46  ;;  %v258_v45 = vld [vmem:[#allocation5 + $0xd8] sm:$0xff] }
  0x87   : > { %v343_v56 = vld [vmem:[#allocation5 + $0x380] sm:$0xff]  ;;  %v2337_v59 = vcombine.high %v335_v48, %v339_v49  ;;  %v2339_v60 = vcombine.high %v336_v53, %v340_v54  ;;  %v344_v61 = vld [vmem:[#allocation5 + $0x388] sm:$0xff]  ;;  %v262_v46 = vld [vmem:[#allocation5 + $0xf8] sm:$0xff] }
  0x88   : > { %1012 = vmatpush1.bf16.msra.mxu0 %v2280_v63  ;;  %v347_v57 = vld [vmem:[#allocation5 + $0x3a0] sm:$0xff]  ;;  %v348_v62 = vld [vmem:[#allocation5 + $0x3a8] sm:$0xff]  ;;  %v2336_v63 = vcombine.low %v335_v48, %v339_v49  ;;  %v270_v48 = vld [vmem:[#allocation5 + $0x138] sm:$0xff] }
  0x89   : > { %1053 = vmatpush1.bf16.msra.mxu1 %v2282_v3  ;;  %1013 = vmatprep.subr.bf16.mxu0 %v2289_v4  ;;  %v351_v2 = vld [vmem:[#allocation5 + $0x3c0] sm:$0xff]  ;;  %v2338_v4 = vcombine.low %v336_v53, %v340_v54  ;;  %v2345_v5 = vcombine.high %v343_v56, %v347_v57  ;;  %v2347_v6 = vcombine.high %v344_v61, %v348_v62  ;;  %v352_v7 = vld [vmem:[#allocation5 + $0x3c8] sm:$0xff]  ;;  %v273_v53 = vld [vmem:[#allocation5 + $0x150] sm:$0xff] }
  0x8a   : > { %1054 = vmatprep.subr.bf16.mxu1 %v2291_v8  ;;  %v355_v3 = vld [vmem:[#allocation5 + $0x3e0] sm:$0xff]  ;;  %v356_v8 = vld [vmem:[#allocation5 + $0x3e8] sm:$0xff]  ;;  %v2346_v10 = vcombine.low %v344_v61, %v348_v62  ;;  %v277_v54 = vld [vmem:[#allocation5 + $0x170] sm:$0xff] }
  0x8b   : > { %v2353_v11 = vcombine.high %v351_v2, %v355_v3  ;;  %v2354_v14 = vcombine.low %v352_v7, %v356_v8  ;;  %v281_v61 = vld [vmem:[#allocation5 + $0x190] sm:$0xff] }
  0x8c   : > { %1014 = vmatpush1.bf16.msra.mxu0 %v2288_v9  ;;  %v2344_v9 = vcombine.low %v343_v56, %v347_v57  ;;  %v278_v56 = vld [vmem:[#allocation5 + $0x178] sm:$0xff]  ;;  %v285_v62 = vld [vmem:[#allocation5 + $0x1b0] sm:$0xff] }
  0x8d   : > { %1055 = vmatpush1.bf16.msra.mxu1 %v2290_v12  ;;  %1015 = vmatprep.subr.bf16.mxu0 %v2297_v13  ;;  %v2355_v12 = vcombine.high %v352_v7, %v356_v8  ;;  %v2352_v13 = vcombine.low %v351_v2, %v355_v3  ;;  %v286_v2 = vld [vmem:[#allocation5 + $0x1b8] sm:$0xff]  ;;  %v2276_v3 = vcombine.low %v273_v53, %v277_v54  ;;  %v289_v7 = vld [vmem:[#allocation5 + $0x1d0] sm:$0xff] }
  0x8e   : > { %1056 = vmatprep.subr.bf16.mxu1 %v2299_v16  ;;  %v2239_v16 = vcombine.high %v3147_v27, %v3149_v28  ;;  %v2263_v28 = vcombine.high %v258_v45, %v262_v46  ;;  %v293_v8 = vld [vmem:[#allocation5 + $0x1f0] sm:$0xff] }
  0x90   : > { %1016 = vmatpush1.bf16.msra.mxu0 %v2296_v17 }
  0x91   : > { %1057 = vmatpush1.bf16.msra.mxu1 %v2298_v20  ;;  %1017 = vmatprep.subr.bf16.mxu0 %v2305_v21 }
  0x92   : > { %1058 = vmatprep.subr.bf16.mxu1 %v2307_v24  ;;  %v245_v24 = vld [vmem:[#allocation5 + $0x70] sm:$0xff] }
  0x94   : > { %1018 = vmatpush1.bf16.msra.mxu0 %v2304_v29  ;;  %v242_v29 = vld [vmem:[#allocation5 + $0x58] sm:$0xff] }
  0x95   : > { %1059 = vmatpush1.bf16.msra.mxu1 %v2306_v34  ;;  %1019 = vmatprep.subr.bf16.mxu0 %v2313_v35  ;;  %v249_v35 = vld [vmem:[#allocation5 + $0x90] sm:$0xff]  ;;  %v2247_v37 = vcombine.high %v242_v29, %v246_v30 }
  0x96   : > { %1060 = vmatprep.subr.bf16.mxu1 %v2315_v36  ;;  %v2245_v36 = vcombine.high %v241_v23, %v245_v24  ;;  %v2253_v41 = vcombine.high %v249_v35, %v253_v38  ;;  %v2252_v25 = vcombine.low %v249_v35, %v253_v38  ;;  %v313_v38 = vld [vmem:[#allocation5 + $0x290] sm:$0xff] }
  0x98   : > { %1020 = vmatpush1.bf16.msra.mxu0 %v2312_v39  ;;  %v250_v39 = vld [vmem:[#allocation5 + $0x98] sm:$0xff] }
  0x99   : > { %1061 = vmatpush1.bf16.msra.mxu1 %v2314_v42  ;;  %1021 = vmatprep.subr.bf16.mxu0 %v2321_v43  ;;  %v2255_v42 = vcombine.high %v250_v39, %v254_v40  ;;  %v257_v43 = vld [vmem:[#allocation5 + $0xd0] sm:$0xff]  ;;  %v2254_v26 = vcombine.low %v250_v39, %v254_v40  ;;  %v314_v40 = vld [vmem:[#allocation5 + $0x298] sm:$0xff] }
  0x9a   : > { %1062 = vmatprep.subr.bf16.mxu1 %v2323_v44  ;;  %v261_v44 = vld [vmem:[#allocation5 + $0xf0] sm:$0xff] }
  0x9b   : > { %v2261_v27 = vcombine.high %v257_v43, %v261_v44  ;;  %v2260_v49 = vcombine.low %v257_v43, %v261_v44  ;;  %v317_v39 = vld [vmem:[#allocation5 + $0x2b0] sm:$0xff] }
  0x9c   : > { %1022 = vmatpush1.bf16.msra.mxu0 %v2320_v47  ;;  %v266_v47 = vld [vmem:[#allocation5 + $0x118] sm:$0xff]  ;;  %v321_v44 = vld [vmem:[#allocation5 + $0x2d0] sm:$0xff] }
  0x9d   : > { %1063 = vmatpush1.bf16.msra.mxu1 %v2322_v50  ;;  %1023 = vmatprep.subr.bf16.mxu0 %v2329_v51  ;;  %v2262_v50 = vcombine.low %v258_v45, %v262_v46  ;;  %v325_v45 = vld [vmem:[#allocation5 + $0x2f0] sm:$0xff]  ;;  %v322_v46 = vld [vmem:[#allocation5 + $0x2d8] sm:$0xff] }
  0x9e   : > { %1064 = vmatprep.subr.bf16.mxu1 %v2331_v52  ;;  %v2271_v52 = vcombine.high %v266_v47, %v270_v48 }
  0xa0   : > { %1024 = vmatpush1.bf16.msra.mxu0 %v2328_v55  ;;  %v274_v55 = vld [vmem:[#allocation5 + $0x158] sm:$0xff] }
  0xa1   : > { %1065 = vmatpush1.bf16.msra.mxu1 %v2330_v58  ;;  %1025 = vmatprep.subr.bf16.mxu0 %v2337_v59  ;;  %v2270_v58 = vcombine.low %v266_v47, %v270_v48  ;;  %v2277_v59 = vcombine.high %v273_v53, %v277_v54  ;;  %v333_v47 = vld [vmem:[#allocation5 + $0x330] sm:$0xff]  ;;  %v330_v48 = vld [vmem:[#allocation5 + $0x318] sm:$0xff] }
  0xa2   : > { %1066 = vmatprep.subr.bf16.mxu1 %v2339_v60  ;;  %v2279_v60 = vcombine.high %v274_v55, %v278_v56  ;;  %v337_v54 = vld [vmem:[#allocation5 + $0x350] sm:$0xff] }
  0xa4   : > { %1026 = vmatpush1.bf16.msra.mxu0 %v2336_v63  ;;  %v282_v63 = vld [vmem:[#allocation5 + $0x198] sm:$0xff] }
  0xa5   : > { %1067 = vmatpush1.bf16.msra.mxu1 %v2338_v4  ;;  %1027 = vmatprep.subr.bf16.mxu0 %v2345_v5  ;;  %v2278_v4 = vcombine.low %v274_v55, %v278_v56  ;;  %v2285_v5 = vcombine.high %v281_v61, %v285_v62  ;;  %v341_v55 = vld [vmem:[#allocation5 + $0x370] sm:$0xff]  ;;  %v338_v56 = vld [vmem:[#allocation5 + $0x358] sm:$0xff] }
  0xa6   : > { %1068 = vmatprep.subr.bf16.mxu1 %v2347_v6  ;;  %v2287_v6 = vcombine.high %v282_v63, %v286_v2 }
  0xa8   : > { %1028 = vmatpush1.bf16.msra.mxu0 %v2344_v9  ;;  %v290_v9 = vld [vmem:[#allocation5 + $0x1d8] sm:$0xff] }
  0xa9   : > { %1069 = vmatpush1.bf16.msra.mxu1 %v2346_v10  ;;  %1029 = vmatprep.subr.bf16.mxu0 %v2353_v11  ;;  %v294_v10 = vld [vmem:[#allocation5 + $0x1f8] sm:$0xff]  ;;  %v2284_v11 = vcombine.low %v281_v61, %v285_v62  ;;  %v345_v62 = vld [vmem:[#allocation5 + $0x390] sm:$0xff] }
  0xaa   : > { %1070 = vmatprep.subr.bf16.mxu1 %v2355_v12  ;;  %v2286_v12 = vcombine.low %v282_v63, %v286_v2  ;;  %v349_v63 = vld [vmem:[#allocation5 + $0x3b0] sm:$0xff]  ;;  %v346_v2 = vld [vmem:[#allocation5 + $0x398] sm:$0xff] }
  0xac   : > { %1030 = vmatpush1.bf16.msra.mxu0 %v2352_v13  ;;  %v2293_v13 = vcombine.high %v289_v7, %v293_v8 }
  0xad   : > { %1071 = vmatpush1.bf16.msra.mxu1 %v2354_v14  ;;  %1081 = vmatprep.subr.bf16.mxu0 %v2237_v15  ;;  %v2295_v14 = vcombine.high %v290_v9, %v294_v10  ;;  %v297_v15 = vld [vmem:[#allocation5 + $0x210] sm:$0xff] }
  0xae   : > { %1122 = vmatprep.subr.bf16.mxu1 %v2239_v16  ;;  %v301_v16 = vld [vmem:[#allocation5 + $0x230] sm:$0xff] }
  0xfd   : > { %v222_v17 = vpop.xlane.xlu0 %221 }
  0xfe   : > { %v224_v18 = vmul.f32 0.00390625, %v222_v17  ;;  %v298_v17 = vld [vmem:[#allocation5 + $0x218] sm:$0xff] }
 0x100   : > { %v225_v19 = vadd.f32 1e-06, %v224_v18  ;;  %v302_v18 = vld [vmem:[#allocation5 + $0x238] sm:$0xff] }
 0x101   : > { %v2302_v35 = vcombine.low %v298_v17, %v302_v18 }
 0x102   : > { %2758 = vrsqrt.f32 %v225_v19  ;;  %v2292_v19 = vcombine.low %v289_v7, %v293_v8  ;;  %v353_v8 = vld [vmem:[#allocation5 + $0x3d0] sm:$0xff] }
 0x10c   : > { %v2759_v20 = vpop.eup %2758 }
 0x10d   : > { %v228_v21 = vmul.f32 %v2759_v20, %v3137_v1  ;;  %v227_v22 = vmul.f32 %v2759_v20, %v3134_v0  ;;  %v2244_v0 = vcombine.low %v241_v23, %v245_v24  ;;  %v2246_v1 = vcombine.low %v242_v29, %v246_v30  ;;  %v305_v23 = vld [vmem:[#allocation5 + $0x250] sm:$0xff]  ;;  %v306_v29 = vld [vmem:[#allocation5 + $0x258] sm:$0xff] }
 0x10e   : > { %v2294_v20 = vcombine.low %v290_v9, %v294_v10  ;;  %v309_v24 = vld [vmem:[#allocation5 + $0x270] sm:$0xff]  ;;  %v310_v30 = vld [vmem:[#allocation5 + $0x278] sm:$0xff] }
 0x10f   : > { %v230_v31 = vpack.c.bf16 %v228_v21, %v228_v21  ;;  %v3161_v34 = vpack.c.bf16 %v227_v22, %v227_v22  ;;  %v2301_v21 = vcombine.high %v297_v15, %v301_v16  ;;  %v2303_v22 = vcombine.high %v298_v17, %v302_v18  ;;  %v357_v9 = vld [vmem:[#allocation5 + $0x3f0] sm:$0xff]  ;;  %v354_v10 = vld [vmem:[#allocation5 + $0x3d8] sm:$0xff]  ;;  %v2568_v18 = vld [vmem:[#allocation7 + $0x4] ss:$8 sps:$4 sm:$0xff]  }
 0x111   : > { %1031 = vmatprep.mubr.bf16.mxu0 %v230_v31  ;;  %1072 = vmatprep.mubr.bf16.mxu1 %v230_v31 }
 0x112   : > { %1032 = vmatmul.mubr.bf16.vlgmr.msra.gmra.mrb[0].mxu0 %v3161_v34  ;;  %1073 = vmatmul.mubr.bf16.vlgmr.msra.gmra.mrb[0].mxu1 %v3161_v34 }
 0x113   : > { %1082 = vmatpush1.bf16.msra.mxu0 %v2236_v32  ;;  %1123 = vmatpush1.bf16.msra.mxu1 %v2238_v33  ;;  %v265_v32 = vld [vmem:[#allocation5 + $0x110] sm:$0xff] }
 0x114   : > { %1113 = vmatprep.mubr.bf16.mxu0 %v230_v31  ;;  %1154 = vmatprep.mubr.bf16.mxu1 %v230_v31  ;;  %v269_v33 = vld [vmem:[#allocation5 + $0x130] sm:$0xff]  ;;  %v2300_v31 = vcombine.low %v297_v15, %v301_v16  ;;  %v2356_v16 = vcombine.low %v353_v8, %v357_v9 }
 0x115   : > { %1083 = vmatprep.subr.bf16.mxu0 %v2245_v36  ;;  %1124 = vmatprep.subr.bf16.mxu1 %v2247_v37  ;;  %v2269_v51 = vcombine.high %v265_v32, %v269_v33  ;;  %v2268_v57 = vcombine.low %v265_v32, %v269_v33  ;;  %v2309_v36 = vcombine.high %v305_v23, %v309_v24  ;;  %v329_v33 = vld [vmem:[#allocation5 + $0x310] sm:$0xff] }
 0x116   : > { %v2311_v37 = vcombine.high %v306_v29, %v310_v30 }
 0x117   : > { %1084 = vmatpush1.bf16.msra.mxu0 %v2244_v0  ;;  %1125 = vmatpush1.bf16.msra.mxu1 %v2246_v1  ;;  %v318_v0 = vld [vmem:[#allocation5 + $0x2b8] sm:$0xff]  ;;  %v2308_v1 = vcombine.low %v305_v23, %v309_v24 }
 0x118   : > { %1085 = vmatprep.subr.bf16.mxu0 %v2253_v41  ;;  %1126 = vmatprep.subr.bf16.mxu1 %v2255_v42  ;;  %v2310_v41 = vcombine.low %v306_v29, %v310_v30  ;;  %v2317_v42 = vcombine.high %v313_v38, %v317_v39  ;;  %v2319_v43 = vcombine.high %v314_v40, %v318_v0  ;;  %v2577_v23 = vld [vmem:[#allocation7 + $0x114] ss:$8 sps:$4 sm:$0xff]   ;;  %v2572_v24 = vld [vmem:[#allocation7 + $0x10] ss:$8 sps:$4 sm:$0xff]   ;;  %v2580_v30 = vld [vmem:[#allocation7 + $0x24] ss:$8 sps:$4 sm:$0xff]  }
 0x119   : > { %v2575_v29 = vld [vmem:[#allocation7 + $0x110] ss:$8 sps:$4 sm:$0xff]  }
 0x11b   : > { %1086 = vmatpush1.bf16.msra.mxu0 %v2252_v25  ;;  %1127 = vmatpush1.bf16.msra.mxu1 %v2254_v26  ;;  %v326_v25 = vld [vmem:[#allocation5 + $0x2f8] sm:$0xff]  ;;  %v2316_v26 = vcombine.low %v313_v38, %v317_v39 }
 0x11c   : > { %1087 = vmatprep.subr.bf16.mxu0 %v2261_v27  ;;  %1128 = vmatprep.subr.bf16.mxu1 %v2263_v28  ;;  %v2318_v27 = vcombine.low %v314_v40, %v318_v0  ;;  %v2325_v28 = vcombine.high %v321_v44, %v325_v45  ;;  %v2327_v32 = vcombine.high %v322_v46, %v326_v25  ;;  %v2589_v38 = vld [vmem:[#allocation7 + $0x134] ss:$8 sps:$4 sm:$0xff]   ;;  %v2584_v39 = vld [vmem:[#allocation7 + $0x30] ss:$8 sps:$4 sm:$0xff]   ;;  %v2592_v40 = vld [vmem:[#allocation7 + $0x44] ss:$8 sps:$4 sm:$0xff]  }
 0x11d   : > { %v2595_v0 = vld [vmem:[#allocation7 + $0x144] ss:$8 sps:$4 sm:$0xff]  }
 0x11f   : > { %1088 = vmatpush1.bf16.msra.mxu0 %v2260_v49  ;;  %1129 = vmatpush1.bf16.msra.mxu1 %v2262_v50  ;;  %v334_v49 = vld [vmem:[#allocation5 + $0x338] sm:$0xff]  ;;  %v2324_v50 = vcombine.low %v321_v44, %v325_v45 }
 0x120   : > { %1089 = vmatprep.subr.bf16.mxu0 %v2269_v51  ;;  %1130 = vmatprep.subr.bf16.mxu1 %v2271_v52  ;;  %v2326_v51 = vcombine.low %v322_v46, %v326_v25  ;;  %v2333_v52 = vcombine.high %v329_v33, %v333_v47  ;;  %v2335_v53 = vcombine.high %v330_v48, %v334_v49  ;;  %v2596_v44 = vld [vmem:[#allocation7 + $0x50] ss:$8 sps:$4 sm:$0xff]   ;;  %v2604_v46 = vld [vmem:[#allocation7 + $0x64] ss:$8 sps:$4 sm:$0xff]  }
 0x121   : > { %v2599_v45 = vld [vmem:[#allocation7 + $0x150] ss:$8 sps:$4 sm:$0xff]   ;;  %v2607_v25 = vld [vmem:[#allocation7 + $0x164] ss:$8 sps:$4 sm:$0xff]  }
 0x123   : > { %1090 = vmatpush1.bf16.msra.mxu0 %v2268_v57  ;;  %1131 = vmatpush1.bf16.msra.mxu1 %v2270_v58  ;;  %v342_v57 = vld [vmem:[#allocation5 + $0x378] sm:$0xff]  ;;  %v2332_v58 = vcombine.low %v329_v33, %v333_v47 }
 0x124   : > { %1091 = vmatprep.subr.bf16.mxu0 %v2277_v59  ;;  %1132 = vmatprep.subr.bf16.mxu1 %v2279_v60  ;;  %v2334_v59 = vcombine.low %v330_v48, %v334_v49  ;;  %v2341_v60 = vcombine.high %v337_v54, %v341_v55  ;;  %v2343_v61 = vcombine.high %v338_v56, %v342_v57  ;;  %v2608_v33 = vld [vmem:[#allocation7 + $0x70] ss:$8 sps:$4 sm:$0xff]   ;;  %v2616_v48 = vld [vmem:[#allocation7 + $0x84] ss:$8 sps:$4 sm:$0xff]  }
 0x125   : > { %v2611_v47 = vld [vmem:[#allocation7 + $0x170] ss:$8 sps:$4 sm:$0xff]   ;;  %v2619_v49 = vld [vmem:[#allocation7 + $0x184] ss:$8 sps:$4 sm:$0xff]  }
 0x127   : > { %1092 = vmatpush1.bf16.msra.mxu0 %v2276_v3  ;;  %1133 = vmatpush1.bf16.msra.mxu1 %v2278_v4  ;;  %v350_v3 = vld [vmem:[#allocation5 + $0x3b8] sm:$0xff]  ;;  %v2340_v4 = vcombine.low %v337_v54, %v341_v55 }
 0x128   : > { %1093 = vmatprep.subr.bf16.mxu0 %v2285_v5  ;;  %1134 = vmatprep.subr.bf16.mxu1 %v2287_v6  ;;  %v2342_v5 = vcombine.low %v338_v56, %v342_v57  ;;  %v2349_v6 = vcombine.high %v345_v62, %v349_v63  ;;  %v2351_v7 = vcombine.high %v346_v2, %v350_v3  ;;  %v2620_v54 = vld [vmem:[#allocation7 + $0x90] ss:$8 sps:$4 sm:$0xff]   ;;  %v2628_v56 = vld [vmem:[#allocation7 + $0xa4] ss:$8 sps:$4 sm:$0xff]  }
 0x129   : > { %v2623_v55 = vld [vmem:[#allocation7 + $0x190] ss:$8 sps:$4 sm:$0xff]   ;;  %v2631_v57 = vld [vmem:[#allocation7 + $0x1a4] ss:$8 sps:$4 sm:$0xff]  }
 0x12b   : > { %1094 = vmatpush1.bf16.msra.mxu0 %v2284_v11  ;;  %1135 = vmatpush1.bf16.msra.mxu1 %v2286_v12  ;;  %v358_v11 = vld [vmem:[#allocation5 + $0x3f8] sm:$0xff]  ;;  %v2348_v12 = vcombine.low %v345_v62, %v349_v63 }
 0x12c   : > { %1095 = vmatprep.subr.bf16.mxu0 %v2293_v13  ;;  %1136 = vmatprep.subr.bf16.mxu1 %v2295_v14  ;;  %v2350_v13 = vcombine.low %v346_v2, %v350_v3  ;;  %v2357_v14 = vcombine.high %v353_v8, %v357_v9  ;;  %v2359_v15 = vcombine.high %v354_v10, %v358_v11  ;;  %v2632_v62 = vld [vmem:[#allocation7 + $0xb0] ss:$8 sps:$4 sm:$0xff]   ;;  %v2640_v2 = vld [vmem:[#allocation7 + $0xc4] ss:$8 sps:$4 sm:$0xff]  }
 0x12d   : > { %v2358_v17 = vcombine.low %v354_v10, %v358_v11  ;;  %v2635_v63 = vld [vmem:[#allocation7 + $0x1b0] ss:$8 sps:$4 sm:$0xff]   ;;  %v2643_v3 = vld [vmem:[#allocation7 + $0x1c4] ss:$8 sps:$4 sm:$0xff]  }
 0x12e   : > { %v2644_v8 = vld [vmem:[#allocation7 + $0xd0] ss:$8 sps:$4 sm:$0xff]   ;;  %v2652_v10 = vld [vmem:[#allocation7 + $0xe4] ss:$8 sps:$4 sm:$0xff]  }
 0x12f   : > { %1096 = vmatpush1.bf16.msra.mxu0 %v2292_v19  ;;  %1137 = vmatpush1.bf16.msra.mxu1 %v2294_v20  ;;  %v2571_v19 = vld [vmem:[#allocation7 + $0x104] ss:$8 sps:$4 sm:$0xff]   ;;  %v2566_v20 = vld [vmem:[#allocation7] ss:$8 sps:$4 sm:$0xff]   ;;  %v2647_v9 = vld [vmem:[#allocation7 + $0x1d0] ss:$8 sps:$4 sm:$0xff]  }
 0x130   : > { %1097 = vmatprep.subr.bf16.mxu0 %v2301_v21  ;;  %1138 = vmatprep.subr.bf16.mxu1 %v2303_v22  ;;  %v2569_v21 = vld [vmem:[#allocation7 + $0x100] ss:$8 sps:$4 sm:$0xff]   ;;  %v2574_v22 = vld [vmem:[#allocation7 + $0x14] ss:$8 sps:$4 sm:$0xff]   ;;  %v2655_v11 = vld [vmem:[#allocation7 + $0x1e4] ss:$8 sps:$4 sm:$0xff]  }
 0x133   : > { %1098 = vmatpush1.bf16.msra.mxu0 %v2300_v31  ;;  %1139 = vmatpush1.bf16.msra.mxu1 %v2302_v35  ;;  %v2583_v31 = vld [vmem:[#allocation7 + $0x124] ss:$8 sps:$4 sm:$0xff]   ;;  %v2578_v35 = vld [vmem:[#allocation7 + $0x20] ss:$8 sps:$4 sm:$0xff]  }
 0x134   : > { %1099 = vmatprep.subr.bf16.mxu0 %v2309_v36  ;;  %1140 = vmatprep.subr.bf16.mxu1 %v2311_v37  ;;  %v2581_v36 = vld [vmem:[#allocation7 + $0x120] ss:$8 sps:$4 sm:$0xff]   ;;  %v2586_v37 = vld [vmem:[#allocation7 + $0x34] ss:$8 sps:$4 sm:$0xff]  }
 0x137   : > { %1100 = vmatpush1.bf16.msra.mxu0 %v2308_v1  ;;  %1141 = vmatpush1.bf16.msra.mxu1 %v2310_v41  ;;  %v2590_v1 = vld [vmem:[#allocation7 + $0x40] ss:$8 sps:$4 sm:$0xff]  }
 0x138   : > { %1101 = vmatprep.subr.bf16.mxu0 %v2317_v42  ;;  %1142 = vmatprep.subr.bf16.mxu1 %v2319_v43  ;;  %v2593_v41 = vld [vmem:[#allocation7 + $0x140] ss:$8 sps:$4 sm:$0xff]   ;;  %v2598_v42 = vld [vmem:[#allocation7 + $0x54] ss:$8 sps:$4 sm:$0xff]  }
 0x139   : > { %v2601_v43 = vld [vmem:[#allocation7 + $0x154] ss:$8 sps:$4 sm:$0xff]  }
 0x13b   : > { %1102 = vmatpush1.bf16.msra.mxu0 %v2316_v26  ;;  %1143 = vmatpush1.bf16.msra.mxu1 %v2318_v27  ;;  %v2602_v26 = vld [vmem:[#allocation7 + $0x60] ss:$8 sps:$4 sm:$0xff]  }
 0x13c   : > { %1103 = vmatprep.subr.bf16.mxu0 %v2325_v28  ;;  %1144 = vmatprep.subr.bf16.mxu1 %v2327_v32  ;;  %v2605_v27 = vld [vmem:[#allocation7 + $0x160] ss:$8 sps:$4 sm:$0xff]   ;;  %v2610_v28 = vld [vmem:[#allocation7 + $0x74] ss:$8 sps:$4 sm:$0xff]  }
 0x13d   : > { %v2613_v32 = vld [vmem:[#allocation7 + $0x174] ss:$8 sps:$4 sm:$0xff]  }
 0x13f   : > { %1104 = vmatpush1.bf16.msra.mxu0 %v2324_v50  ;;  %1145 = vmatpush1.bf16.msra.mxu1 %v2326_v51  ;;  %v2614_v50 = vld [vmem:[#allocation7 + $0x80] ss:$8 sps:$4 sm:$0xff]  }
 0x140   : > { %1105 = vmatprep.subr.bf16.mxu0 %v2333_v52  ;;  %1146 = vmatprep.subr.bf16.mxu1 %v2335_v53  ;;  %v2617_v51 = vld [vmem:[#allocation7 + $0x180] ss:$8 sps:$4 sm:$0xff]   ;;  %v2622_v52 = vld [vmem:[#allocation7 + $0x94] ss:$8 sps:$4 sm:$0xff]  }
 0x141   : > { %v2625_v53 = vld [vmem:[#allocation7 + $0x194] ss:$8 sps:$4 sm:$0xff]  }
 0x143   : > { %1106 = vmatpush1.bf16.msra.mxu0 %v2332_v58  ;;  %1147 = vmatpush1.bf16.msra.mxu1 %v2334_v59  ;;  %v2626_v58 = vld [vmem:[#allocation7 + $0xa0] ss:$8 sps:$4 sm:$0xff]  }
 0x144   : > { %1107 = vmatprep.subr.bf16.mxu0 %v2341_v60  ;;  %1148 = vmatprep.subr.bf16.mxu1 %v2343_v61  ;;  %v2629_v59 = vld [vmem:[#allocation7 + $0x1a0] ss:$8 sps:$4 sm:$0xff]   ;;  %v2634_v60 = vld [vmem:[#allocation7 + $0xb4] ss:$8 sps:$4 sm:$0xff]  }
 0x145   : > { %v2637_v61 = vld [vmem:[#allocation7 + $0x1b4] ss:$8 sps:$4 sm:$0xff]  }
 0x147   : > { %1108 = vmatpush1.bf16.msra.mxu0 %v2340_v4  ;;  %1149 = vmatpush1.bf16.msra.mxu1 %v2342_v5  ;;  %v2638_v4 = vld [vmem:[#allocation7 + $0xc0] ss:$8 sps:$4 sm:$0xff]  }
 0x148   : > { %1109 = vmatprep.subr.bf16.mxu0 %v2349_v6  ;;  %1150 = vmatprep.subr.bf16.mxu1 %v2351_v7  ;;  %v2641_v5 = vld [vmem:[#allocation7 + $0x1c0] ss:$8 sps:$4 sm:$0xff]   ;;  %v2646_v6 = vld [vmem:[#allocation7 + $0xd4] ss:$8 sps:$4 sm:$0xff]  }
 0x149   : > { %v2649_v7 = vld [vmem:[#allocation7 + $0x1d4] ss:$8 sps:$4 sm:$0xff]  }
 0x14b   : > { %1110 = vmatpush1.bf16.msra.mxu0 %v2348_v12  ;;  %1151 = vmatpush1.bf16.msra.mxu1 %v2350_v13  ;;  %v2650_v12 = vld [vmem:[#allocation7 + $0xe0] ss:$8 sps:$4 sm:$0xff]  }
 0x14c   : > { %1111 = vmatprep.subr.bf16.mxu0 %v2357_v14  ;;  %1152 = vmatprep.subr.bf16.mxu1 %v2359_v15  ;;  %v2653_v13 = vld [vmem:[#allocation7 + $0x1e0] ss:$8 sps:$4 sm:$0xff]   ;;  %v2658_v14 = vld [vmem:[#allocation7 + $0xf4] ss:$8 sps:$4 sm:$0xff]  }
 0x14d   : > { %v2661_v15 = vld [vmem:[#allocation7 + $0x1f4] ss:$8 sps:$4 sm:$0xff]  }
 0x14f   : > { %1112 = vmatpush1.bf16.msra.mxu0 %v2356_v16  ;;  %1153 = vmatpush1.bf16.msra.mxu1 %v2358_v17  ;;  %v2656_v16 = vld [vmem:[#allocation7 + $0xf0] ss:$8 sps:$4 sm:$0xff]  }
 0x150   : > { %1947 = vmatprep.subr.bf16.mxu0 %v2568_v18  ;;  %1988 = vmatprep.subr.bf16.mxu1 %v2571_v19  ;;  %v2659_v17 = vld [vmem:[#allocation7 + $0x1f0] ss:$8 sps:$4 sm:$0xff]   ;;  %v2664_v18 = vld [vmem:[#allocation7 + $0x204] ss:$8 sps:$4 sm:$0xff]  }
 0x151   : > { %v2667_v19 = vld [vmem:[#allocation7 + $0x304] ss:$8 sps:$4 sm:$0xff]  }
 0x152   : > { %1114 = vmatmul.mubr.bf16.vlgmr.msra.gmra.mrb[4].mxu0 %v3161_v34  ;;  %1155 = vmatmul.mubr.bf16.vlgmr.msra.gmra.mrb[4].mxu1 %v3161_v34  ;;  %v2587_v34 = vld [vmem:[#allocation7 + $0x130] ss:$8 sps:$4 sm:$0xff]  }
 0x153   : > { %1948 = vmatpush1.bf16.msra.mxu0 %v2566_v20  ;;  %1989 = vmatpush1.bf16.msra.mxu1 %v2569_v21 }
 0x154   : > { %1949 = vmatprep.subr.bf16.mxu0 %v2574_v22  ;;  %1990 = vmatprep.subr.bf16.mxu1 %v2577_v23 }
 0x157   : > { %1950 = vmatpush1.bf16.msra.mxu0 %v2572_v24  ;;  %1991 = vmatpush1.bf16.msra.mxu1 %v2575_v29 }
 0x158   : > { %1951 = vmatprep.subr.bf16.mxu0 %v2580_v30  ;;  %1992 = vmatprep.subr.bf16.mxu1 %v2583_v31 }
 0x15b   : > { %1952 = vmatpush1.bf16.msra.mxu0 %v2578_v35  ;;  %1993 = vmatpush1.bf16.msra.mxu1 %v2581_v36 }
 0x15c   : > { %1953 = vmatprep.subr.bf16.mxu0 %v2586_v37  ;;  %1994 = vmatprep.subr.bf16.mxu1 %v2589_v38 }
 0x15f   : > { %1954 = vmatpush1.bf16.msra.mxu0 %v2584_v39  ;;  %1995 = vmatpush1.bf16.msra.mxu1 %v2587_v34 }
 0x160   : > { %1955 = vmatprep.subr.bf16.mxu0 %v2592_v40  ;;  %1996 = vmatprep.subr.bf16.mxu1 %v2595_v0  ;;  %v2662_v40 = vld [vmem:[#allocation7 + $0x200] ss:$8 sps:$4 sm:$0xff]  }
 0x161   : > { %v2665_v0 = vld [vmem:[#allocation7 + $0x300] ss:$8 sps:$4 sm:$0xff]  }
 0x163   : > { %1956 = vmatpush1.bf16.msra.mxu0 %v2590_v1  ;;  %1997 = vmatpush1.bf16.msra.mxu1 %v2593_v41 }
 0x164   : > { %1957 = vmatprep.subr.bf16.mxu0 %v2598_v42  ;;  %1998 = vmatprep.subr.bf16.mxu1 %v2601_v43  ;;  %v2670_v42 = vld [vmem:[#allocation7 + $0x214] ss:$8 sps:$4 sm:$0xff]  }
 0x165   : > { %v2673_v43 = vld [vmem:[#allocation7 + $0x314] ss:$8 sps:$4 sm:$0xff]  }
 0x167   : > { %1958 = vmatpush1.bf16.msra.mxu0 %v2596_v44  ;;  %1999 = vmatpush1.bf16.msra.mxu1 %v2599_v45  ;;  %v2668_v44 = vld [vmem:[#allocation7 + $0x210] ss:$8 sps:$4 sm:$0xff]  }
 0x168   : > { %1959 = vmatprep.subr.bf16.mxu0 %v2604_v46  ;;  %2000 = vmatprep.subr.bf16.mxu1 %v2607_v25  ;;  %v2671_v45 = vld [vmem:[#allocation7 + $0x310] ss:$8 sps:$4 sm:$0xff]   ;;  %v2676_v46 = vld [vmem:[#allocation7 + $0x224] ss:$8 sps:$4 sm:$0xff]  }
 0x169   : > { %v2679_v25 = vld [vmem:[#allocation7 + $0x324] ss:$8 sps:$4 sm:$0xff]  }
 0x16b   : > { %1960 = vmatpush1.bf16.msra.mxu0 %v2602_v26  ;;  %2001 = vmatpush1.bf16.msra.mxu1 %v2605_v27  ;;  %v2674_v26 = vld [vmem:[#allocation7 + $0x220] ss:$8 sps:$4 sm:$0xff]  }
 0x16c   : > { %1961 = vmatprep.subr.bf16.mxu0 %v2610_v28  ;;  %2002 = vmatprep.subr.bf16.mxu1 %v2613_v32  ;;  %v2677_v27 = vld [vmem:[#allocation7 + $0x320] ss:$8 sps:$4 sm:$0xff]   ;;  %v2682_v28 = vld [vmem:[#allocation7 + $0x234] ss:$8 sps:$4 sm:$0xff]  }
 0x16d   : > { %v2685_v32 = vld [vmem:[#allocation7 + $0x334] ss:$8 sps:$4 sm:$0xff]  }
 0x16f   : > { %1962 = vmatpush1.bf16.msra.mxu0 %v2608_v33  ;;  %2003 = vmatpush1.bf16.msra.mxu1 %v2611_v47  ;;  %v2680_v33 = vld [vmem:[#allocation7 + $0x230] ss:$8 sps:$4 sm:$0xff]  }
 0x170   : > { %1963 = vmatprep.subr.bf16.mxu0 %v2616_v48  ;;  %2004 = vmatprep.subr.bf16.mxu1 %v2619_v49  ;;  %v2683_v47 = vld [vmem:[#allocation7 + $0x330] ss:$8 sps:$4 sm:$0xff]   ;;  %v2688_v48 = vld [vmem:[#allocation7 + $0x244] ss:$8 sps:$4 sm:$0xff]  }
 0x171   : > { %v2691_v49 = vld [vmem:[#allocation7 + $0x344] ss:$8 sps:$4 sm:$0xff]  }
 0x173   : > { %1964 = vmatpush1.bf16.msra.mxu0 %v2614_v50  ;;  %2005 = vmatpush1.bf16.msra.mxu1 %v2617_v51  ;;  %v2686_v50 = vld [vmem:[#allocation7 + $0x240] ss:$8 sps:$4 sm:$0xff]  }
 0x174   : > { %1965 = vmatprep.subr.bf16.mxu0 %v2622_v52  ;;  %2006 = vmatprep.subr.bf16.mxu1 %v2625_v53  ;;  %v2689_v51 = vld [vmem:[#allocation7 + $0x340] ss:$8 sps:$4 sm:$0xff]   ;;  %v2694_v52 = vld [vmem:[#allocation7 + $0x254] ss:$8 sps:$4 sm:$0xff]  }
 0x175   : > { %v2697_v53 = vld [vmem:[#allocation7 + $0x354] ss:$8 sps:$4 sm:$0xff]  }
 0x177   : > { %1966 = vmatpush1.bf16.msra.mxu0 %v2620_v54  ;;  %2007 = vmatpush1.bf16.msra.mxu1 %v2623_v55  ;;  %v2692_v54 = vld [vmem:[#allocation7 + $0x250] ss:$8 sps:$4 sm:$0xff]  }
 0x178   : > { %1967 = vmatprep.subr.bf16.mxu0 %v2628_v56  ;;  %2008 = vmatprep.subr.bf16.mxu1 %v2631_v57  ;;  %v2695_v55 = vld [vmem:[#allocation7 + $0x350] ss:$8 sps:$4 sm:$0xff]   ;;  %v2700_v56 = vld [vmem:[#allocation7 + $0x264] ss:$8 sps:$4 sm:$0xff]  }
 0x179   : > { %v2703_v57 = vld [vmem:[#allocation7 + $0x364] ss:$8 sps:$4 sm:$0xff]  }
 0x17b   : > { %1968 = vmatpush1.bf16.msra.mxu0 %v2626_v58  ;;  %2009 = vmatpush1.bf16.msra.mxu1 %v2629_v59  ;;  %v2698_v58 = vld [vmem:[#allocation7 + $0x260] ss:$8 sps:$4 sm:$0xff]  }
 0x17c   : > { %1969 = vmatprep.subr.bf16.mxu0 %v2634_v60  ;;  %2010 = vmatprep.subr.bf16.mxu1 %v2637_v61  ;;  %v2701_v59 = vld [vmem:[#allocation7 + $0x360] ss:$8 sps:$4 sm:$0xff]   ;;  %v2706_v60 = vld [vmem:[#allocation7 + $0x274] ss:$8 sps:$4 sm:$0xff]  }
 0x17d   : > { %v2709_v61 = vld [vmem:[#allocation7 + $0x374] ss:$8 sps:$4 sm:$0xff]  }
 0x17f   : > { %1970 = vmatpush1.bf16.msra.mxu0 %v2632_v62  ;;  %2011 = vmatpush1.bf16.msra.mxu1 %v2635_v63  ;;  %v2704_v62 = vld [vmem:[#allocation7 + $0x270] ss:$8 sps:$4 sm:$0xff]  }
 0x180   : > { %1971 = vmatprep.subr.bf16.mxu0 %v2640_v2  ;;  %2012 = vmatprep.subr.bf16.mxu1 %v2643_v3  ;;  %v2707_v63 = vld [vmem:[#allocation7 + $0x370] ss:$8 sps:$4 sm:$0xff]   ;;  %v2712_v2 = vld [vmem:[#allocation7 + $0x284] ss:$8 sps:$4 sm:$0xff]  }
 0x181   : > { %v2715_v3 = vld [vmem:[#allocation7 + $0x384] ss:$8 sps:$4 sm:$0xff]  }
 0x183   : > { %1972 = vmatpush1.bf16.msra.mxu0 %v2638_v4  ;;  %2013 = vmatpush1.bf16.msra.mxu1 %v2641_v5  ;;  %v2710_v4 = vld [vmem:[#allocation7 + $0x280] ss:$8 sps:$4 sm:$0xff]  }
 0x184   : > { %1973 = vmatprep.subr.bf16.mxu0 %v2646_v6  ;;  %2014 = vmatprep.subr.bf16.mxu1 %v2649_v7  ;;  %v2713_v5 = vld [vmem:[#allocation7 + $0x380] ss:$8 sps:$4 sm:$0xff]   ;;  %v2718_v6 = vld [vmem:[#allocation7 + $0x294] ss:$8 sps:$4 sm:$0xff]  }
 0x185   : > { %v2721_v7 = vld [vmem:[#allocation7 + $0x394] ss:$8 sps:$4 sm:$0xff]  }
 0x187   : > { %1974 = vmatpush1.bf16.msra.mxu0 %v2644_v8  ;;  %2015 = vmatpush1.bf16.msra.mxu1 %v2647_v9  ;;  %v2716_v8 = vld [vmem:[#allocation7 + $0x290] ss:$8 sps:$4 sm:$0xff]  }
 0x188   : > { %1975 = vmatprep.subr.bf16.mxu0 %v2652_v10  ;;  %2016 = vmatprep.subr.bf16.mxu1 %v2655_v11  ;;  %v2719_v9 = vld [vmem:[#allocation7 + $0x390] ss:$8 sps:$4 sm:$0xff]   ;;  %v2724_v10 = vld [vmem:[#allocation7 + $0x2a4] ss:$8 sps:$4 sm:$0xff]  }
 0x189   : > { %v2727_v11 = vld [vmem:[#allocation7 + $0x3a4] ss:$8 sps:$4 sm:$0xff]  }
 0x18b   : > { %1976 = vmatpush1.bf16.msra.mxu0 %v2650_v12  ;;  %2017 = vmatpush1.bf16.msra.mxu1 %v2653_v13  ;;  %v2722_v12 = vld [vmem:[#allocation7 + $0x2a0] ss:$8 sps:$4 sm:$0xff]  }
 0x18c   : > { %1977 = vmatprep.subr.bf16.mxu0 %v2658_v14  ;;  %2018 = vmatprep.subr.bf16.mxu1 %v2661_v15  ;;  %v2725_v13 = vld [vmem:[#allocation7 + $0x3a0] ss:$8 sps:$4 sm:$0xff]   ;;  %v2730_v14 = vld [vmem:[#allocation7 + $0x2b4] ss:$8 sps:$4 sm:$0xff]  }
 0x18d   : > { %v2733_v15 = vld [vmem:[#allocation7 + $0x3b4] ss:$8 sps:$4 sm:$0xff]  }
 0x18f   : > { %1978 = vmatpush1.bf16.msra.mxu0 %v2656_v16  ;;  %2019 = vmatpush1.bf16.msra.mxu1 %v2659_v17  ;;  %v2728_v16 = vld [vmem:[#allocation7 + $0x2b0] ss:$8 sps:$4 sm:$0xff]  }
 0x190   : > { %2029 = vmatprep.subr.bf16.mxu0 %v2664_v18  ;;  %2070 = vmatprep.subr.bf16.mxu1 %v2667_v19  ;;  %v2731_v17 = vld [vmem:[#allocation7 + $0x3b0] ss:$8 sps:$4 sm:$0xff]   ;;  %v2736_v18 = vld [vmem:[#allocation7 + $0x2c4] ss:$8 sps:$4 sm:$0xff]  }
 0x191   : > { %v2739_v19 = vld [vmem:[#allocation7 + $0x3c4] ss:$8 sps:$4 sm:$0xff]  }
 0x1e5   : > { %v1033_v20 = vpop.f32.mrb[0].mxu0  ;;  %v1074_v21 = vpop.f32.mrb[0].mxu1 }
 0x1e6   : > { %v1163_v22 = vmax.f32 %v1033_v20, 0.0  ;;  %v1165_v23 = vmax.f32 %v1074_v21, 0.0  ;;  %v1035_v24 = vpop.f32.mrb[1].mxu0  ;;  %v1076_v29 = vpop.f32.mrb[1].mxu1  ;;  %v2734_v20 = vld [vmem:[#allocation7 + $0x2c0] ss:$8 sps:$4 sm:$0xff]  }
 0x1e7   : > { %v1164_v30 = vmax.f32 %v1035_v24, 0.0  ;;  %v1166_v31 = vmax.f32 %v1076_v29, 0.0  ;;  %v1037_v35 = vpop.f32.mrb[2].mxu0  ;;  %v1078_v36 = vpop.f32.mrb[2].mxu1  ;;  %v2737_v21 = vld [vmem:[#allocation7 + $0x3c0] ss:$8 sps:$4 sm:$0xff]  }
 0x1e8   : > { %v1038_v37 = vpop.f32.mrb[3].mxu0  ;;  %v1079_v38 = vpop.f32.mrb[3].mxu1  ;;  %v1171_v1 = vpack.c.bf16 %v1163_v22, %v1163_v22  ;;  %v1173_v41 = vpack.c.bf16 %v1165_v23, %v1165_v23  ;;  %v2742_v22 = vld [vmem:[#allocation7 + $0x2d4] ss:$8 sps:$4 sm:$0xff]   ;;  %v2740_v24 = vld [vmem:[#allocation7 + $0x2d0] ss:$8 sps:$4 sm:$0xff]  }
 0x1e9   : > { %v1172_v39 = vpack.c.bf16 %v1164_v30, %v1164_v30  ;;  %v1174_v34 = vpack.c.bf16 %v1166_v31, %v1166_v31  ;;  %v2745_v23 = vld [vmem:[#allocation7 + $0x3d4] ss:$8 sps:$4 sm:$0xff]   ;;  %v2743_v29 = vld [vmem:[#allocation7 + $0x3d0] ss:$8 sps:$4 sm:$0xff]   ;;  %v2748_v30 = vld [vmem:[#allocation7 + $0x2e4] ss:$8 sps:$4 sm:$0xff]  }
 0x1ea   : > { %v2751_v31 = vld [vmem:[#allocation7 + $0x3e4] ss:$8 sps:$4 sm:$0xff]   ;;  %v2746_v35 = vld [vmem:[#allocation7 + $0x2e0] ss:$8 sps:$4 sm:$0xff]   ;;  %v2754_v37 = vld [vmem:[#allocation7 + $0x2f4] ss:$8 sps:$4 sm:$0xff]  }
 0x1eb   : > { %1979 = vmatprep.mubr.bf16.mxu0 %v1172_v39  ;;  %2020 = vmatprep.mubr.bf16.mxu1 %v1174_v34  ;;  %v2749_v36 = vld [vmem:[#allocation7 + $0x3e0] ss:$8 sps:$4 sm:$0xff]   ;;  %v2757_v38 = vld [vmem:[#allocation7 + $0x3f4] ss:$8 sps:$4 sm:$0xff]  }
 0x1ec   : > { %1980 = vmatmul.mubr.bf16.vlgmr.msra.gmra.mrb[8].mxu0 %v1171_v1  ;;  %2021 = vmatmul.mubr.bf16.vlgmr.msra.gmra.mrb[8].mxu1 %v1173_v41 }
 0x1ed   : > { %2030 = vmatpush1.bf16.msra.mxu0 %v2662_v40  ;;  %2071 = vmatpush1.bf16.msra.mxu1 %v2665_v0  ;;  %v2752_v40 = vld [vmem:[#allocation7 + $0x2f0] ss:$8 sps:$4 sm:$0xff]  }
 0x1ee   : > { %2031 = vmatprep.subr.bf16.mxu0 %v2670_v42  ;;  %2072 = vmatprep.subr.bf16.mxu1 %v2673_v43  ;;  %v2755_v0 = vld [vmem:[#allocation7 + $0x3f0] ss:$8 sps:$4 sm:$0xff]  }
 0x1f1   : > { %2032 = vmatpush1.bf16.msra.mxu0 %v2668_v44  ;;  %2073 = vmatpush1.bf16.msra.mxu1 %v2671_v45 }
 0x1f2   : > { %2033 = vmatprep.subr.bf16.mxu0 %v2676_v46  ;;  %2074 = vmatprep.subr.bf16.mxu1 %v2679_v25 }
 0x1f5   : > { %2034 = vmatpush1.bf16.msra.mxu0 %v2674_v26  ;;  %2075 = vmatpush1.bf16.msra.mxu1 %v2677_v27 }
 0x1f6   : > { %2035 = vmatprep.subr.bf16.mxu0 %v2682_v28  ;;  %2076 = vmatprep.subr.bf16.mxu1 %v2685_v32 }
 0x1f9   : > { %2036 = vmatpush1.bf16.msra.mxu0 %v2680_v33  ;;  %2077 = vmatpush1.bf16.msra.mxu1 %v2683_v47 }
 0x1fa   : > { %2037 = vmatprep.subr.bf16.mxu0 %v2688_v48  ;;  %2078 = vmatprep.subr.bf16.mxu1 %v2691_v49 }
 0x1fd   : > { %2038 = vmatpush1.bf16.msra.mxu0 %v2686_v50  ;;  %2079 = vmatpush1.bf16.msra.mxu1 %v2689_v51 }
 0x1fe   : > { %2039 = vmatprep.subr.bf16.mxu0 %v2694_v52  ;;  %2080 = vmatprep.subr.bf16.mxu1 %v2697_v53 }
 0x201   : > { %2040 = vmatpush1.bf16.msra.mxu0 %v2692_v54  ;;  %2081 = vmatpush1.bf16.msra.mxu1 %v2695_v55 }
 0x202   : > { %2041 = vmatprep.subr.bf16.mxu0 %v2700_v56  ;;  %2082 = vmatprep.subr.bf16.mxu1 %v2703_v57 }
 0x205   : > { %2042 = vmatpush1.bf16.msra.mxu0 %v2698_v58  ;;  %2083 = vmatpush1.bf16.msra.mxu1 %v2701_v59 }
 0x206   : > { %2043 = vmatprep.subr.bf16.mxu0 %v2706_v60  ;;  %2084 = vmatprep.subr.bf16.mxu1 %v2709_v61 }
 0x209   : > { %2044 = vmatpush1.bf16.msra.mxu0 %v2704_v62  ;;  %2085 = vmatpush1.bf16.msra.mxu1 %v2707_v63 }
 0x20a   : > { %2045 = vmatprep.subr.bf16.mxu0 %v2712_v2  ;;  %2086 = vmatprep.subr.bf16.mxu1 %v2715_v3 }
 0x20d   : > { %2046 = vmatpush1.bf16.msra.mxu0 %v2710_v4  ;;  %2087 = vmatpush1.bf16.msra.mxu1 %v2713_v5 }
 0x20e   : > { %2047 = vmatprep.subr.bf16.mxu0 %v2718_v6  ;;  %2088 = vmatprep.subr.bf16.mxu1 %v2721_v7 }
 0x211   : > { %2048 = vmatpush1.bf16.msra.mxu0 %v2716_v8  ;;  %2089 = vmatpush1.bf16.msra.mxu1 %v2719_v9  ;;  %v2760_v8 = vld [vmem:[%s3123_s30] sm:$0xff] }
 0x212   : > { %2049 = vmatprep.subr.bf16.mxu0 %v2724_v10  ;;  %2090 = vmatprep.subr.bf16.mxu1 %v2727_v11  ;;  %v2761_v10 = vld [vmem:[%s3123_s30 + $0x8] sm:$0xff] }
 0x215   : > { %2050 = vmatpush1.bf16.msra.mxu0 %v2722_v12  ;;  %2091 = vmatpush1.bf16.msra.mxu1 %v2725_v13 }
 0x216   : > { %2051 = vmatprep.subr.bf16.mxu0 %v2730_v14  ;;  %2092 = vmatprep.subr.bf16.mxu1 %v2733_v15 }
 0x219   : > { %2052 = vmatpush1.bf16.msra.mxu0 %v2728_v16  ;;  %2093 = vmatpush1.bf16.msra.mxu1 %v2731_v17 }
 0x21a   : > { %2053 = vmatprep.subr.bf16.mxu0 %v2736_v18  ;;  %2094 = vmatprep.subr.bf16.mxu1 %v2739_v19 }
 0x21d   : > { %2054 = vmatpush1.bf16.msra.mxu0 %v2734_v20  ;;  %2095 = vmatpush1.bf16.msra.mxu1 %v2737_v21 }
 0x21e   : > { %2055 = vmatprep.subr.bf16.mxu0 %v2742_v22  ;;  %2096 = vmatprep.subr.bf16.mxu1 %v2745_v23 }
 0x221   : > { %2056 = vmatpush1.bf16.msra.mxu0 %v2740_v24  ;;  %2097 = vmatpush1.bf16.msra.mxu1 %v2743_v29 }
 0x222   : > { %2057 = vmatprep.subr.bf16.mxu0 %v2748_v30  ;;  %2098 = vmatprep.subr.bf16.mxu1 %v2751_v31 }
 0x225   : > { %v1115_v39 = vpop.f32.mrb[4].mxu0  ;;  %v1156_v34 = vpop.f32.mrb[4].mxu1  ;;  %2058 = vmatpush1.bf16.msra.mxu0 %v2746_v35  ;;  %2099 = vmatpush1.bf16.msra.mxu1 %v2749_v36 }
 0x226   : > { %v1167_v1 = vmax.f32 %v1115_v39, 0.0  ;;  %v1169_v41 = vmax.f32 %v1156_v34, 0.0  ;;  %v1117_v42 = vpop.f32.mrb[5].mxu0  ;;  %v1158_v43 = vpop.f32.mrb[5].mxu1  ;;  %2059 = vmatprep.subr.bf16.mxu0 %v2754_v37  ;;  %2100 = vmatprep.subr.bf16.mxu1 %v2757_v38 }
 0x227   : > { %v1168_v44 = vmax.f32 %v1117_v42, 0.0  ;;  %v1170_v45 = vmax.f32 %v1158_v43, 0.0  ;;  %v1119_v46 = vpop.f32.mrb[6].mxu0  ;;  %v1160_v25 = vpop.f32.mrb[6].mxu1 }
 0x228   : > { %v1120_v26 = vpop.f32.mrb[7].mxu0  ;;  %v1161_v27 = vpop.f32.mrb[7].mxu1  ;;  %v1175_v33 = vpack.c.bf16 %v1167_v1, %v1167_v1  ;;  %v1177_v47 = vpack.c.bf16 %v1169_v41, %v1169_v41 }
 0x229   : > { %v1176_v28 = vpack.c.bf16 %v1168_v44, %v1168_v44  ;;  %v1178_v32 = vpack.c.bf16 %v1170_v45, %v1170_v45  ;;  %2060 = vmatpush1.bf16.msra.mxu0 %v2752_v40  ;;  %2101 = vmatpush1.bf16.msra.mxu1 %v2755_v0 }
 0x22b   : > { %2061 = vmatprep.mubr.bf16.mxu0 %v1176_v28  ;;  %2102 = vmatprep.mubr.bf16.mxu1 %v1178_v32 }
 0x22c   : > { %2062 = vmatmul.mubr.bf16.vlgmr.msra.gmra.mrb[12].mxu0 %v1175_v33  ;;  %2103 = vmatmul.mubr.bf16.vlgmr.msra.gmra.mrb[12].mxu1 %v1177_v47 }
 0x2bf   : > { %v1981_v48 = vpop.f32.mrb[8].mxu0  ;;  %v2022_v49 = vpop.f32.mrb[8].mxu1 }
 0x2c0   : > { %v2023_v50 = vadd.f32 %v2022_v49, %v1981_v48  ;;  %v1983_v51 = vpop.f32.mrb[9].mxu0  ;;  %v2024_v52 = vpop.f32.mrb[9].mxu1 }
 0x2c1   : > { %v2025_v53 = vadd.f32 %v2024_v52, %v1983_v51  ;;  %v1985_v54 = vpop.f32.mrb[10].mxu0  ;;  %v2026_v55 = vpop.f32.mrb[10].mxu1 }
 0x2c2   : > { %v1986_v56 = vpop.f32.mrb[11].mxu0  ;;  %v2027_v57 = vpop.f32.mrb[11].mxu1 }
 0x2ff   : > { %v2063_v58 = vpop.f32.mrb[12].mxu0  ;;  %v2104_v59 = vpop.f32.mrb[12].mxu1 }
 0x300   : > { %v2064_v60 = vadd.f32 %v2063_v58, %v2023_v50  ;;  %v2065_v61 = vpop.f32.mrb[13].mxu0  ;;  %v2106_v62 = vpop.f32.mrb[13].mxu1 }
 0x301   : > { %v2066_v63 = vadd.f32 %v2065_v61, %v2025_v53  ;;  %v2067_v2 = vpop.f32.mrb[14].mxu0  ;;  %v2108_v3 = vpop.f32.mrb[14].mxu1 }
 0x302   : > { %v2105_v4 = vadd.f32 %v2104_v59, %v2064_v60  ;;  %v2068_v5 = vpop.f32.mrb[15].mxu0  ;;  %v2109_v6 = vpop.f32.mrb[15].mxu1 }
 0x303   : > { %v2107_v7 = vadd.f32 %v2106_v62, %v2066_v63 }
 0x304   : > { %v2111_v9 = vadd.f32 %v2760_v8, %v2105_v4 }
 0x305   : > { %v2112_v11 = vadd.f32 %v2761_v10, %v2107_v7 }
 0x306   : > { %2113 = vst [vmem:[%s215_s20] sm:$0xff] %v2111_v9 }
 0x307   : > { %2114 = vst [vmem:[%s215_s20 + $0x8] sm:$0xff] %v2112_v11 }
 0x308   : > { %2861 = shalt.err (!%p2858_p2)
}
 0x309   : > { %s2862_s23 = scalar_lea.hbm %s3181_s22, 256  ;;  %s2866_s17 = scalar_lea.hbm %s3228_s3, 512 }
 0x30a   : > { %p2863_p13 = scmp.ne.s32.totalorder %s3181_s22, %s2862_s23  ;;  %p2867_p4 = scmp.lt.u32.totalorder %s3181_s22, %s3228_s3 }
 0x30b   : > { %p2868_p7 = scmp.lt.u32.totalorder %s2866_s17, %s2862_s23  ;;  %p2870_p11 = scmp.lt.u32.totalorder %s2862_s23, %s3181_s22 }
 0x30c   : > { %p2864_p6 = pnand %p2863_p13, %p3242_p0 }
 0x30d   : > { %p2869_p8 = por %p2868_p7, %p2867_p4 }
 0x30e   : > { %p2865_p10 = pneg %p2864_p6 }
 0x30f   : > { %p2871_p1 = por %p2870_p11, %p2869_p8 }
 0x311   : > { %p2872_p3 = pnand %p2871_p1, %p2865_p10 }
 0x313   : > { %2875 = shalt.err (!%p2872_p3)
}
 0x314   : > { %2505 = dma.vmem_to_hbm [thread:$0]  (%p3242_p0), %s3183_s24, 256, %s3181_s22, %s2116_s16  }
 0x315 PF: > { %s2142_s29 = sand.u32 1, %s2906_s12   ;;  %p3243_p5 = scmp.ne.s32.totalorder %s3233_s19, 0 }
 0x316   : > { %p3244_p9 = scmp.ge.s32.totalorder %s2918_s15, 2  ;;  %s2143_s30 = scalar_lea.sflag [#allocation4], %s2142_s29 }
 0x318   : > { %p2519_p12 = pnand %p3244_p9, %p3243_p5 }
 0x31a   : > { %2901 = dma.done.wait (!%p2519_p12), %s2143_s30, 256  }
 0x31b   : > { %2903 = vsyncadd (!%p2519_p12), %s2143_s30, 4294967040  ;;  %p17_p2 = scmp.ge.s32.totalorder %s3058_s6, 4   ;;  %s3245_s12 = smov %s2910_s13 }
 0x31c   : > { %s3246_s13 = smov %s2914_s14  ;;  %s3247_s14 = smov %s3067_s9 }
 0x31d   : > { %s3248_s15 = smov %s3058_s6  ;;  %19 = sbr.rel (!%p17_p2) target bundleno = 6 (0x6), region = 85 }
 0x324   :  { %2148 = vsyncpa [#allocation3], 1 }
 0x325   :  { %2150 = vsyncpa [#allocation3 + $0x1], 1 }
 0x326   :  { %2151 = vsyncpa [#allocation6], 1 }
 0x327   :  { %2152 = vsyncpa [#allocation4], 1 }
 0x328   :  { %2154 = vsyncpa [#allocation4 + $0x1], 1 }

// kernel: tpu_custom_call.1
= control target key start
LH: loop header
LB: loop body
LE: loop exit
PB: predicated region body
PF: predicated region fallthrough
CT: control target
= control target key end

     0   :  { %8 = vsyncpa [#allocation3], 0  ;;  %s3225_s0 = inlined_call_operand.hbm [shape: f32[16,256], index: 0, kind: input, shape index: {}]   ;;  %s3226_s1 = inlined_call_operand.hbm [shape: bf16[256,1024], index: 1, kind: input, shape index: {}]   ;;  %s3227_s2 = inlined_call_operand.hbm [shape: bf16[1024,256], index: 2, kind: input, shape index: {}]   ;;  %s3228_s3 = inlined_call_operand.hbm [shape: f32[16,256], index: 3, kind: output, shape index: {}]  }
   0x1   :  { %10 = vsyncpa [#allocation3 + $0x1], 0 }
   0x2   :  { %11 = vsyncpa [#allocation6], 0 }
   0x3   :  { %12 = vsyncpa [#allocation4], 0 }
   0x4   :  { %14 = vsyncpa [#allocation4 + $0x1], 0  ;;  %s2948_s12 = smov 0   ;;  %s2950_s13 = smov 0  }
   0x5   :  { %s2952_s14 = smov 0   ;;  %s2954_s15 = smov 0  }
   0x6 LB: > { %s2969_s16 = sadd.s32 4294967295, %s2918_s15   ;;  %s2219_s17 = sadd.s32 4294967294, %s2918_s15   ;;  %s2918_s15 = sphi %s2954_s15, %s3248_s15   ;;  %s2914_s14 = sphi %s2952_s14, %s3247_s14   ;;  %s2910_s13 = sphi %s2950_s13, %s3246_s13   ;;  %s2906_s12 = sphi %s2948_s12, %s3245_s12  }
   0x7   : > { %p40_p0 = scmp.ne.s32.totalorder %s2910_s13, %s2906_s12  ;;  %p3229_p1 = scmp.eq.s32.totalorder %s2969_s16, 0 }
   0x8   : > { %p112_p3 = scmp.eq.s32.totalorder %s2219_s17, 1  ;;  %p2220_p5 = scmp.ge.s32.totalorder %s2918_s15, 1 }
   0x9   : > { %p2978_p4 = por %p3229_p1, %p40_p0  ;;  %p119_p7 = scmp.lt.s32.totalorder %s2918_s15, 3 }
   0xa   : > { %p2983_p6 = por %p112_p3, %p40_p0  ;;  %s2920_s21 = smov [#allocation5]  }
   0xb   : > { %s3232_s18 = scalar_select %p2978_p4, 1, 0 }
   0xc   : > { %s3233_s19 = scalar_select %p2983_p6, 1, 0 }
   0xd   : > { %p2988_p8 = pnand %p2220_p5, %p119_p7  ;;  %s131_s22 = sshll.u32 %s2920_s21, 4  ;;  %s2992_s22 = int_to_ptr.vmem [resolvable:$true] %s131_s22 }
   0xe   : > { %s2921_s24 = smov [#allocation7]   ;;  %s2762_s28 = scalar_lea.hbm %s3226_s1, 16384 }
   0xf   : > { %p2507_p9 = pneg %p2988_p8  ;;  %s144_s25 = sshll.u32 %s2921_s24, 4  ;;  %s3003_s25 = int_to_ptr.vmem [resolvable:$true] %s144_s25 }
  0x10   : > { %p2763_p12 = scmp.ne.s32.totalorder %s3226_s1, %s2762_s28  ;;  %p2769_p5 = scmp.lt.u32.totalorder %s2762_s28, %s3226_s1 }
  0x11   : > { %p2999_p11 = pnand %p2507_p9, %p3229_p1 }
  0x13   : > { %p2764_p13 = pneg %p2999_p11 }
  0x15   : > { %p2765_p0 = pnand %p2764_p13, %p2763_p12 }
  0x17   : > { %p2766_p3 = pneg %p2765_p0 }
  0x19   : > { %p2771_p7 = pnand %p2769_p5, %p2766_p3 }
  0x1b   : > { %2774 = shalt.err (!%p2771_p7)
}
  0x1c   : > { %s2775_s6 = scalar_lea.vmem %s2992_s22, 16384  ;;  %p2783_p2 = scmp.lt.s32.totalorder %s2992_s22, %s2992_s22 }
  0x1d   : > { %p2776_p9 = scmp.ne.s32.totalorder %s2992_s22, %s2775_s6  ;;  %p2784_p12 = scmp.lt.s32.totalorder %s2775_s6, %s2775_s6 }
  0x1f   : > { %p2778_p10 = pnand %p2776_p9, %p2764_p13  ;;  %p2785_p0 = por %p2784_p12, %p2783_p2 }
  0x21   : > { %p2779_p1 = pneg %p2778_p10 }
  0x23   : > { %p2786_p6 = pnand %p2785_p0, %p2779_p1 }
  0x25   : > { %2789 = shalt.err (!%p2786_p6)
}
  0x26   : > { %s2922_s7 = smov 512   ;;  %s2923_s8 = smov 32  }
  0x27   : > { %2510 = dma.hbm_to_vmem [thread:$0]  (!%p2999_p11), %s3226_s1, 16384, %s2992_s22, [#allocation6], %s2922_s7, %s2922_s7, %s2923_s8  }
  0x28   : > { %s2790_s21 = scalar_lea.hbm %s3227_s2, 16384 }
  0x29   : > { %p2791_p2 = scmp.ne.s32.totalorder %s3227_s2, %s2790_s21  ;;  %p2797_p10 = scmp.lt.u32.totalorder %s2790_s21, %s3227_s2 }
  0x2b   : > { %p2793_p1 = pnand %p2791_p2, %p2764_p13 }
  0x2d   : > { %p2794_p6 = pneg %p2793_p1 }
  0x2f   : > { %p2799_p3 = pnand %p2797_p10, %p2794_p6 }
  0x31   : > { %2802 = shalt.err (!%p2799_p3)
}
  0x32   : > { %s2803_s22 = scalar_lea.vmem %s3003_s25, 16384  ;;  %p2811_p12 = scmp.lt.s32.totalorder %s3003_s25, %s3003_s25 }
  0x33   : > { %p2804_p5 = scmp.ne.s32.totalorder %s3003_s25, %s2803_s22  ;;  %p2812_p0 = scmp.lt.s32.totalorder %s2803_s22, %s2803_s22 }
  0x35   : > { %p2806_p7 = pnand %p2804_p5, %p2764_p13  ;;  %p2813_p2 = por %p2812_p0, %p2811_p12 }
  0x37   : > { %p2807_p9 = pneg %p2806_p7 }
  0x39   : > { %p2814_p1 = pnand %p2813_p2, %p2807_p9 }
  0x3b   : > { %2817 = shalt.err (!%p2814_p1)
}
  0x3c   : > { %s2924_s29 = smov 128   ;;  %s2925_s30 = smov 8  }
  0x3d   : > { %2513 = dma.hbm_to_vmem [thread:$0]  (!%p2999_p11), %s3227_s2, 16384, %s3003_s25, [#allocation6], %s2924_s29, %s2924_s29, %s2925_s30  }
  0x3e   : > { %s3058_s6 = sadd.s32 1, %s2918_s15   ;;  %s27_s8 = sadd.s32 1, %s2914_s14 }
  0x3f   : > { %s24_s7 = ssub.s32 %s2918_s15, %s3058_s6  ;;  %p34_p6 = scmp.ne.s32.totalorder %s2914_s14, %s2910_s13 }
  0x40   : > { %p25_p13 = scmp.eq.s32.totalorder %s24_s7, 0  ;;  %p35_p10 = scmp.eq.s32.totalorder %s2918_s15, 0 }
  0x41   : > { %p3236_p5 = scmp.eq.s32.totalorder %s2969_s16, 1  ;;  %p2524_p9 = scmp.lt.s32.totalorder %s2918_s15, 2 }
  0x42   : > { %s3067_s9 = scalar_select %p25_p13, %s2914_s14, %s27_s8  }
  0x43   : > { %p36_p3 = por %p35_p10, %p34_p6  ;;  %p3071_p7 = por %p3236_p5, %p34_p6 }
  0x44   : > { %s158_s23 = sand.u32 1, %s2914_s14   ;;  %s2493_s25 = sshll.u32 %s2918_s15, 8 }
  0x45   : > { %s3237_s10 = scalar_select %p3071_p7, 1, 0 }
  0x46   : > { %s2224_s11 = sshll.u32 %s158_s23, 4  ;;  %s3081_s24 = scalar_lea.hbm %s3225_s0, %s2493_s25 }
  0x47   : > { %s162_s26 = scalar_lea.vmem [#allocation2], %s2224_s11  ;;  %p3085_p11 = pnand %p2524_p9, %p36_p3 }
  0x48   : > { %s170_s27 = sshll.u32 %s162_s26, 4  ;;  %s159_s22 = scalar_lea.sflag [#allocation3], %s158_s23  ;;  %s3083_s27 = int_to_ptr.vmem [resolvable:$true] %s170_s27 }
  0x49   : > { %s2818_s29 = scalar_lea.hbm %s3081_s24, 256  ;;  %p2820_p0 = pneg %p3085_p11 }
  0x4a   : > { %p2819_p12 = scmp.ne.s32.totalorder %s3081_s24, %s2818_s29  ;;  %s2823_s5 = scalar_lea.hbm %s3225_s0, 512 }
  0x4b   : > { %p2824_p13 = scmp.lt.u32.totalorder %s3081_s24, %s3225_s0  ;;  %p2825_p6 = scmp.lt.u32.totalorder %s2823_s5, %s2818_s29 }
  0x4c   : > { %p2821_p2 = pnand %p2820_p0, %p2819_p12  ;;  %p2827_p3 = scmp.lt.u32.totalorder %s2818_s29, %s3081_s24 }
  0x4d   : > { %p2826_p10 = por %p2825_p6, %p2824_p13 }
  0x4e   : > { %p2822_p1 = pneg %p2821_p2 }
  0x4f   : > { %p2828_p5 = por %p2827_p3, %p2826_p10 }
  0x51   : > { %p2829_p9 = pnand %p2828_p5, %p2822_p1 }
  0x53   : > { %2832 = shalt.err (!%p2829_p9)
}
  0x54   : > { %s2833_s23 = scalar_lea.vmem %s3083_s27, 256  ;;  %s2926_s11 = smov [#allocation2]  }
  0x55   : > { %p2834_p12 = scmp.ne.s32.totalorder %s3083_s27, %s2833_s23  ;;  %s2838_s25 = sshll.u32 %s2926_s11, 4  ;;  %s2839_s25 = int_to_ptr.vmem [resolvable:$false] %s2838_s25 }
  0x56   : > { %s2840_s17 = scalar_lea.vmem %s2839_s25, 512  ;;  %p2841_p4 = scmp.lt.s32.totalorder %s3083_s27, %s2839_s25 }
  0x57   : > { %p2836_p2 = pnand %p2834_p12, %p2820_p0  ;;  %p2842_p13 = scmp.lt.s32.totalorder %s2840_s17, %s2833_s23 }
  0x59   : > { %p2837_p7 = pneg %p2836_p2  ;;  %p2843_p6 = por %p2842_p13, %p2841_p4 }
  0x5b   : > { %p2844_p10 = pnand %p2843_p6, %p2837_p7 }
  0x5d   : > { %2847 = shalt.err (!%p2844_p10)
}
  0x5e   : > { %2517 = dma.hbm_to_vmem [thread:$0]  (!%p3085_p11), %s3081_s24, 256, %s3083_s27, %s159_s22  }
  0x5f   : > { %179 = sbr.rel (%p2988_p8) target bundleno = 789 (0x315), region = 32  ;;  %s3117_s21 = sand.u32 (!%p2988_p8), 1, %s2910_s13  }
  0x60   : > { %s2228_s26 = sshll.u32 (!%p2988_p8), %s3117_s21, 4  ;;  %s182_s29 = scalar_lea.sflag (!%p2988_p8), [#allocation3], %s3117_s21 }
  0x61   : > { %s3123_s30 = scalar_lea.vmem (!%p2988_p8), [#allocation2], %s2228_s26  ;;  %p3239_p4 = scmp.ne.s32.totalorder (!%p2988_p8), %s3232_s18, 0 }
  0x66   : > { %2893 = dma.done.wait (%p3239_p4), %s182_s29, 256  }
  0x67   : > { %2895 = vsyncadd (%p3239_p4), %s182_s29, 4294967040  ;;  %p3240_p7 = scmp.eq.s32.totalorder %s2969_s16, 0 }
  0x69   : > { %2897 = dma.done.wait (%p3240_p7), [#allocation6], 32768   ;;  %p3241_p8 = pmov %p3240_p7 }
  0x6a   : > { %v3134_v0 = vld [vmem:[%s3123_s30] sm:$0xff]  ;;  %v3137_v1 = vld [vmem:[%s3123_s30 + $0x8] sm:$0xff]  ;;  %s2494_s18 = sshll.u32 %s2969_s16, 8  ;;  %s215_s20 = scalar_lea.vmem [#allocation8], %s2228_s26 }
  0x6b   : > { %2899 = vsyncadd (%p3241_p8), [#allocation6], 4294934528  ;;  %v231_v2 = vld [vmem:[#allocation5] sm:$0xff]  ;;  %v218_v3 = vmul.f32 %v3134_v0, %v3134_v0  ;;  %v219_v4 = vmul.f32 %v3137_v1, %v3137_v1  ;;  %v232_v6 = vld [vmem:[#allocation5 + $0x8] sm:$0xff]  ;;  %s2130_s24 = sshll.u32 %s215_s20, 4  ;;  %s3181_s22 = scalar_lea.hbm %s3228_s3, %s2494_s18  ;;  %s3183_s24 = int_to_ptr.vmem [resolvable:$true] %s2130_s24 }
  0x6c   : > { %v235_v5 = vld [vmem:[#allocation5 + $0x20] sm:$0xff]  ;;  %v236_v7 = vld [vmem:[#allocation5 + $0x28] sm:$0xff]  ;;  %s2116_s16 = scalar_lea.sflag [#allocation4], %s3117_s21  ;;  %s2848_s4 = scalar_lea.vmem %s3183_s24, 256 }
  0x6d   : > { %v2233_v8 = vcombine.high %v231_v2, %v235_v5  ;;  %v2235_v9 = vcombine.high %v232_v6, %v236_v7  ;;  %v2232_v10 = vcombine.low %v231_v2, %v235_v5  ;;  %v2234_v11 = vcombine.low %v232_v6, %v236_v7  ;;  %v239_v12 = vld [vmem:[#allocation5 + $0x40] sm:$0xff]  ;;  %v240_v14 = vld [vmem:[#allocation5 + $0x48] sm:$0xff]  ;;  %p2849_p11 = scmp.ne.s32.totalorder %s3183_s24, %s2848_s4  ;;  %p3242_p0 = scmp.ne.s32.totalorder %s3237_s10, 0 }
  0x6e   : > { %v243_v13 = vld [vmem:[#allocation5 + $0x60] sm:$0xff]  ;;  %v220_v15 = vadd.f32 %v219_v4, %v218_v3  ;;  %v244_v17 = vld [vmem:[#allocation5 + $0x68] sm:$0xff]  ;;  %s2927_s5 = smov [#allocation8]  }
  0x6f   : > { %v2241_v16 = vcombine.high %v239_v12, %v243_v13  ;;  %v247_v18 = vld [vmem:[#allocation5 + $0x80] sm:$0xff]  ;;  %999 = vmatprep.subr.bf16.mxu0 %v2233_v8  ;;  %1040 = vmatprep.subr.bf16.mxu1 %v2235_v9  ;;  %v2243_v20 = vcombine.high %v240_v14, %v244_v17  ;;  %v248_v21 = vld [vmem:[#allocation5 + $0x88] sm:$0xff]  ;;  %v2240_v23 = vcombine.low %v239_v12, %v243_v13  ;;  %p2850_p1 = pnand %p2849_p11, %p3242_p0  ;;  %s2852_s7 = sshll.u32 %s2927_s5, 4  ;;  %s2853_s7 = int_to_ptr.vmem [resolvable:$false] %s2852_s7 }
  0x70   : > { %v251_v19 = vld [vmem:[#allocation5 + $0xa0] sm:$0xff]  ;;  %v252_v22 = vld [vmem:[#allocation5 + $0xa8] sm:$0xff]  ;;  %221 = vadd.xlane.f32.xlu0 %v220_v15  ;;  %1000 = vmatpush1.bf16.msra.mxu0 %v2232_v10  ;;  %v2242_v24 = vcombine.low %v240_v14, %v244_v17  ;;  %s2854_s8 = scalar_lea.vmem %s2853_s7, 512  ;;  %p2855_p5 = scmp.lt.s32.totalorder %s3183_s24, %s2853_s7 }
  0x71   : > { %1041 = vmatpush1.bf16.msra.mxu1 %v2234_v11  ;;  %1001 = vmatprep.subr.bf16.mxu0 %v2241_v16  ;;  %v2249_v25 = vcombine.high %v247_v18, %v251_v19  ;;  %v2251_v26 = vcombine.high %v248_v21, %v252_v22  ;;  %v255_v27 = vld [vmem:[#allocation5 + $0xc0] sm:$0xff]  ;;  %v256_v29 = vld [vmem:[#allocation5 + $0xc8] sm:$0xff]  ;;  %v2248_v31 = vcombine.low %v247_v18, %v251_v19  ;;  %p2851_p3 = pneg %p2850_p1  ;;  %p2856_p9 = scmp.lt.s32.totalorder %s2854_s8, %s2848_s4 }
  0x72   : > { %1042 = vmatprep.subr.bf16.mxu1 %v2243_v20  ;;  %v259_v28 = vld [vmem:[#allocation5 + $0xe0] sm:$0xff]  ;;  %v260_v30 = vld [vmem:[#allocation5 + $0xe8] sm:$0xff]  ;;  %v2250_v32 = vcombine.low %v248_v21, %v252_v22 }
  0x73   : > { %v2257_v33 = vcombine.high %v255_v27, %v259_v28  ;;  %v2259_v34 = vcombine.high %v256_v29, %v260_v30  ;;  %v263_v35 = vld [vmem:[#allocation5 + $0x100] sm:$0xff]  ;;  %v264_v37 = vld [vmem:[#allocation5 + $0x108] sm:$0xff]  ;;  %v2256_v39 = vcombine.low %v255_v27, %v259_v28  ;;  %v2258_v40 = vcombine.low %v256_v29, %v260_v30  ;;  %v3147_v27 = vld [vmem:[#allocation5 + $0x18] sm:$0xff]  ;;  %p2857_p12 = por %p2856_p9, %p2855_p5 }
  0x74   : > { %1002 = vmatpush1.bf16.msra.mxu0 %v2240_v23  ;;  %v267_v36 = vld [vmem:[#allocation5 + $0x120] sm:$0xff]  ;;  %v268_v38 = vld [vmem:[#allocation5 + $0x128] sm:$0xff]  ;;  %v3149_v28 = vld [vmem:[#allocation5 + $0x38] sm:$0xff] }
  0x75   : > { %1043 = vmatpush1.bf16.msra.mxu1 %v2242_v24  ;;  %1003 = vmatprep.subr.bf16.mxu0 %v2249_v25  ;;  %v2265_v41 = vcombine.high %v263_v35, %v267_v36  ;;  %v2267_v42 = vcombine.high %v264_v37, %v268_v38  ;;  %v271_v43 = vld [vmem:[#allocation5 + $0x140] sm:$0xff]  ;;  %v272_v45 = vld [vmem:[#allocation5 + $0x148] sm:$0xff]  ;;  %v2264_v47 = vcombine.low %v263_v35, %v267_v36  ;;  %v3143_v25 = vld [vmem:[#allocation5 + $0x10] sm:$0xff]  ;;  %p2858_p2 = pnand %p2857_p12, %p2851_p3 }
  0x76   : > { %1044 = vmatprep.subr.bf16.mxu1 %v2251_v26  ;;  %v275_v44 = vld [vmem:[#allocation5 + $0x160] sm:$0xff]  ;;  %v276_v46 = vld [vmem:[#allocation5 + $0x168] sm:$0xff]  ;;  %v2266_v48 = vcombine.low %v264_v37, %v268_v38  ;;  %v3145_v26 = vld [vmem:[#allocation5 + $0x30] sm:$0xff] }
  0x77   : > { %v2273_v49 = vcombine.high %v271_v43, %v275_v44  ;;  %v2275_v50 = vcombine.high %v272_v45, %v276_v46  ;;  %v279_v51 = vld [vmem:[#allocation5 + $0x180] sm:$0xff]  ;;  %v280_v53 = vld [vmem:[#allocation5 + $0x188] sm:$0xff]  ;;  %v2272_v55 = vcombine.low %v271_v43, %v275_v44  ;;  %v2274_v56 = vcombine.low %v272_v45, %v276_v46 }
  0x78   : > { %1004 = vmatpush1.bf16.msra.mxu0 %v2248_v31  ;;  %v283_v52 = vld [vmem:[#allocation5 + $0x1a0] sm:$0xff]  ;;  %v284_v54 = vld [vmem:[#allocation5 + $0x1a8] sm:$0xff] }
  0x79   : > { %1045 = vmatpush1.bf16.msra.mxu1 %v2250_v32  ;;  %1005 = vmatprep.subr.bf16.mxu0 %v2257_v33  ;;  %v2281_v57 = vcombine.high %v279_v51, %v283_v52  ;;  %v2283_v58 = vcombine.high %v280_v53, %v284_v54  ;;  %v287_v59 = vld [vmem:[#allocation5 + $0x1c0] sm:$0xff]  ;;  %v288_v61 = vld [vmem:[#allocation5 + $0x1c8] sm:$0xff]  ;;  %v2280_v63 = vcombine.low %v279_v51, %v283_v52 }
  0x7a   : > { %1046 = vmatprep.subr.bf16.mxu1 %v2259_v34  ;;  %v291_v60 = vld [vmem:[#allocation5 + $0x1e0] sm:$0xff]  ;;  %v292_v62 = vld [vmem:[#allocation5 + $0x1e8] sm:$0xff]  ;;  %v2282_v3 = vcombine.low %v280_v53, %v284_v54  ;;  %v2236_v32 = vcombine.low %v3143_v25, %v3145_v26  ;;  %v2238_v33 = vcombine.low %v3147_v27, %v3149_v28 }
  0x7b   : > { %v295_v2 = vld [vmem:[#allocation5 + $0x200] sm:$0xff]  ;;  %v2289_v4 = vcombine.high %v287_v59, %v291_v60  ;;  %v296_v6 = vld [vmem:[#allocation5 + $0x208] sm:$0xff]  ;;  %v2291_v8 = vcombine.high %v288_v61, %v292_v62  ;;  %v2288_v9 = vcombine.low %v287_v59, %v291_v60  ;;  %v2290_v12 = vcombine.low %v288_v61, %v292_v62 }
  0x7c   : > { %1006 = vmatpush1.bf16.msra.mxu0 %v2256_v39  ;;  %v299_v5 = vld [vmem:[#allocation5 + $0x220] sm:$0xff]  ;;  %v300_v7 = vld [vmem:[#allocation5 + $0x228] sm:$0xff] }
  0x7d   : > { %1047 = vmatpush1.bf16.msra.mxu1 %v2258_v40  ;;  %1007 = vmatprep.subr.bf16.mxu0 %v2265_v41  ;;  %v303_v10 = vld [vmem:[#allocation5 + $0x240] sm:$0xff]  ;;  %v2297_v13 = vcombine.high %v295_v2, %v299_v5  ;;  %v304_v14 = vld [vmem:[#allocation5 + $0x248] sm:$0xff]  ;;  %v2299_v16 = vcombine.high %v296_v6, %v300_v7  ;;  %v2296_v17 = vcombine.low %v295_v2, %v299_v5 }
  0x7e   : > { %1048 = vmatprep.subr.bf16.mxu1 %v2267_v42  ;;  %v307_v11 = vld [vmem:[#allocation5 + $0x260] sm:$0xff]  ;;  %v308_v15 = vld [vmem:[#allocation5 + $0x268] sm:$0xff]  ;;  %v2298_v20 = vcombine.low %v296_v6, %v300_v7 }
  0x7f   : > { %v311_v18 = vld [vmem:[#allocation5 + $0x280] sm:$0xff]  ;;  %v2305_v21 = vcombine.high %v303_v10, %v307_v11  ;;  %v312_v22 = vld [vmem:[#allocation5 + $0x288] sm:$0xff]  ;;  %v2307_v24 = vcombine.high %v304_v14, %v308_v15  ;;  %v2304_v29 = vcombine.low %v303_v10, %v307_v11  ;;  %v2306_v34 = vcombine.low %v304_v14, %v308_v15 }
  0x80   : > { %1008 = vmatpush1.bf16.msra.mxu0 %v2264_v47  ;;  %v315_v19 = vld [vmem:[#allocation5 + $0x2a0] sm:$0xff]  ;;  %v316_v23 = vld [vmem:[#allocation5 + $0x2a8] sm:$0xff]  ;;  %v2237_v15 = vcombine.high %v3143_v25, %v3145_v26 }
  0x81   : > { %1049 = vmatpush1.bf16.msra.mxu1 %v2266_v48  ;;  %1009 = vmatprep.subr.bf16.mxu0 %v2273_v49  ;;  %v319_v30 = vld [vmem:[#allocation5 + $0x2c0] sm:$0xff]  ;;  %v2313_v35 = vcombine.high %v311_v18, %v315_v19  ;;  %v2315_v36 = vcombine.high %v312_v22, %v316_v23  ;;  %v320_v37 = vld [vmem:[#allocation5 + $0x2c8] sm:$0xff]  ;;  %v2312_v39 = vcombine.low %v311_v18, %v315_v19 }
  0x82   : > { %1050 = vmatprep.subr.bf16.mxu1 %v2275_v50  ;;  %v323_v31 = vld [vmem:[#allocation5 + $0x2e0] sm:$0xff]  ;;  %v324_v38 = vld [vmem:[#allocation5 + $0x2e8] sm:$0xff]  ;;  %v2314_v42 = vcombine.low %v312_v22, %v316_v23  ;;  %v241_v23 = vld [vmem:[#allocation5 + $0x50] sm:$0xff] }
  0x83   : > { %v327_v40 = vld [vmem:[#allocation5 + $0x300] sm:$0xff]  ;;  %v2321_v43 = vcombine.high %v319_v30, %v323_v31  ;;  %v2323_v44 = vcombine.high %v320_v37, %v324_v38  ;;  %v328_v45 = vld [vmem:[#allocation5 + $0x308] sm:$0xff]  ;;  %v2320_v47 = vcombine.low %v319_v30, %v323_v31  ;;  %v2322_v50 = vcombine.low %v320_v37, %v324_v38  ;;  %v246_v30 = vld [vmem:[#allocation5 + $0x78] sm:$0xff] }
  0x84   : > { %1010 = vmatpush1.bf16.msra.mxu0 %v2272_v55  ;;  %v331_v41 = vld [vmem:[#allocation5 + $0x320] sm:$0xff]  ;;  %v332_v46 = vld [vmem:[#allocation5 + $0x328] sm:$0xff]  ;;  %v253_v38 = vld [vmem:[#allocation5 + $0xb0] sm:$0xff] }
  0x85   : > { %1051 = vmatpush1.bf16.msra.mxu1 %v2274_v56  ;;  %1011 = vmatprep.subr.bf16.mxu0 %v2281_v57  ;;  %v335_v48 = vld [vmem:[#allocation5 + $0x340] sm:$0xff]  ;;  %v2329_v51 = vcombine.high %v327_v40, %v331_v41  ;;  %v2331_v52 = vcombine.high %v328_v45, %v332_v46  ;;  %v336_v53 = vld [vmem:[#allocation5 + $0x348] sm:$0xff]  ;;  %v2328_v55 = vcombine.low %v327_v40, %v331_v41  ;;  %v254_v40 = vld [vmem:[#allocation5 + $0xb8] sm:$0xff] }
  0x86   : > { %1052 = vmatprep.subr.bf16.mxu1 %v2283_v58  ;;  %v339_v49 = vld [vmem:[#allocation5 + $0x360] sm:$0xff]  ;;  %v340_v54 = vld [vmem:[#allocation5 + $0x368] sm:$0xff]  ;;  %v2330_v58 = vcombine.low %v328_v45, %v332_v46  ;;  %v258_v45 = vld [vmem:[#allocation5 + $0xd8] sm:$0xff] }
  0x87   : > { %v343_v56 = vld [vmem:[#allocation5 + $0x380] sm:$0xff]  ;;  %v2337_v59 = vcombine.high %v335_v48, %v339_v49  ;;  %v2339_v60 = vcombine.high %v336_v53, %v340_v54  ;;  %v344_v61 = vld [vmem:[#allocation5 + $0x388] sm:$0xff]  ;;  %v262_v46 = vld [vmem:[#allocation5 + $0xf8] sm:$0xff] }
  0x88   : > { %1012 = vmatpush1.bf16.msra.mxu0 %v2280_v63  ;;  %v347_v57 = vld [vmem:[#allocation5 + $0x3a0] sm:$0xff]  ;;  %v348_v62 = vld [vmem:[#allocation5 + $0x3a8] sm:$0xff]  ;;  %v2336_v63 = vcombine.low %v335_v48, %v339_v49  ;;  %v270_v48 = vld [vmem:[#allocation5 + $0x138] sm:$0xff] }
  0x89   : > { %1053 = vmatpush1.bf16.msra.mxu1 %v2282_v3  ;;  %1013 = vmatprep.subr.bf16.mxu0 %v2289_v4  ;;  %v351_v2 = vld [vmem:[#allocation5 + $0x3c0] sm:$0xff]  ;;  %v2338_v4 = vcombine.low %v336_v53, %v340_v54  ;;  %v2345_v5 = vcombine.high %v343_v56, %v347_v57  ;;  %v2347_v6 = vcombine.high %v344_v61, %v348_v62  ;;  %v352_v7 = vld [vmem:[#allocation5 + $0x3c8] sm:$0xff]  ;;  %v273_v53 = vld [vmem:[#allocation5 + $0x150] sm:$0xff] }
  0x8a   : > { %1054 = vmatprep.subr.bf16.mxu1 %v2291_v8  ;;  %v355_v3 = vld [vmem:[#allocation5 + $0x3e0] sm:$0xff]  ;;  %v356_v8 = vld [vmem:[#allocation5 + $0x3e8] sm:$0xff]  ;;  %v2346_v10 = vcombine.low %v344_v61, %v348_v62  ;;  %v277_v54 = vld [vmem:[#allocation5 + $0x170] sm:$0xff] }
  0x8b   : > { %v2353_v11 = vcombine.high %v351_v2, %v355_v3  ;;  %v2354_v14 = vcombine.low %v352_v7, %v356_v8  ;;  %v281_v61 = vld [vmem:[#allocation5 + $0x190] sm:$0xff] }
  0x8c   : > { %1014 = vmatpush1.bf16.msra.mxu0 %v2288_v9  ;;  %v2344_v9 = vcombine.low %v343_v56, %v347_v57  ;;  %v278_v56 = vld [vmem:[#allocation5 + $0x178] sm:$0xff]  ;;  %v285_v62 = vld [vmem:[#allocation5 + $0x1b0] sm:$0xff] }
  0x8d   : > { %1055 = vmatpush1.bf16.msra.mxu1 %v2290_v12  ;;  %1015 = vmatprep.subr.bf16.mxu0 %v2297_v13  ;;  %v2355_v12 = vcombine.high %v352_v7, %v356_v8  ;;  %v2352_v13 = vcombine.low %v351_v2, %v355_v3  ;;  %v286_v2 = vld [vmem:[#allocation5 + $0x1b8] sm:$0xff]  ;;  %v2276_v3 = vcombine.low %v273_v53, %v277_v54  ;;  %v289_v7 = vld [vmem:[#allocation5 + $0x1d0] sm:$0xff] }
  0x8e   : > { %1056 = vmatprep.subr.bf16.mxu1 %v2299_v16  ;;  %v2239_v16 = vcombine.high %v3147_v27, %v3149_v28  ;;  %v2263_v28 = vcombine.high %v258_v45, %v262_v46  ;;  %v293_v8 = vld [vmem:[#allocation5 + $0x1f0] sm:$0xff] }
  0x90   : > { %1016 = vmatpush1.bf16.msra.mxu0 %v2296_v17 }
  0x91   : > { %1057 = vmatpush1.bf16.msra.mxu1 %v2298_v20  ;;  %1017 = vmatprep.subr.bf16.mxu0 %v2305_v21 }
  0x92   : > { %1058 = vmatprep.subr.bf16.mxu1 %v2307_v24  ;;  %v245_v24 = vld [vmem:[#allocation5 + $0x70] sm:$0xff] }
  0x94   : > { %1018 = vmatpush1.bf16.msra.mxu0 %v2304_v29  ;;  %v242_v29 = vld [vmem:[#allocation5 + $0x58] sm:$0xff] }
  0x95   : > { %1059 = vmatpush1.bf16.msra.mxu1 %v2306_v34  ;;  %1019 = vmatprep.subr.bf16.mxu0 %v2313_v35  ;;  %v249_v35 = vld [vmem:[#allocation5 + $0x90] sm:$0xff]  ;;  %v2247_v37 = vcombine.high %v242_v29, %v246_v30 }
  0x96   : > { %1060 = vmatprep.subr.bf16.mxu1 %v2315_v36  ;;  %v2245_v36 = vcombine.high %v241_v23, %v245_v24  ;;  %v2253_v41 = vcombine.high %v249_v35, %v253_v38  ;;  %v2252_v25 = vcombine.low %v249_v35, %v253_v38  ;;  %v313_v38 = vld [vmem:[#allocation5 + $0x290] sm:$0xff] }
  0x98   : > { %1020 = vmatpush1.bf16.msra.mxu0 %v2312_v39  ;;  %v250_v39 = vld [vmem:[#allocation5 + $0x98] sm:$0xff] }
  0x99   : > { %1061 = vmatpush1.bf16.msra.mxu1 %v2314_v42  ;;  %1021 = vmatprep.subr.bf16.mxu0 %v2321_v43  ;;  %v2255_v42 = vcombine.high %v250_v39, %v254_v40  ;;  %v257_v43 = vld [vmem:[#allocation5 + $0xd0] sm:$0xff]  ;;  %v2254_v26 = vcombine.low %v250_v39, %v254_v40  ;;  %v314_v40 = vld [vmem:[#allocation5 + $0x298] sm:$0xff] }
  0x9a   : > { %1062 = vmatprep.subr.bf16.mxu1 %v2323_v44  ;;  %v261_v44 = vld [vmem:[#allocation5 + $0xf0] sm:$0xff] }
  0x9b   : > { %v2261_v27 = vcombine.high %v257_v43, %v261_v44  ;;  %v2260_v49 = vcombine.low %v257_v43, %v261_v44  ;;  %v317_v39 = vld [vmem:[#allocation5 + $0x2b0] sm:$0xff] }
  0x9c   : > { %1022 = vmatpush1.bf16.msra.mxu0 %v2320_v47  ;;  %v266_v47 = vld [vmem:[#allocation5 + $0x118] sm:$0xff]  ;;  %v321_v44 = vld [vmem:[#allocation5 + $0x2d0] sm:$0xff] }
  0x9d   : > { %1063 = vmatpush1.bf16.msra.mxu1 %v2322_v50  ;;  %1023 = vmatprep.subr.bf16.mxu0 %v2329_v51  ;;  %v2262_v50 = vcombine.low %v258_v45, %v262_v46  ;;  %v325_v45 = vld [vmem:[#allocation5 + $0x2f0] sm:$0xff]  ;;  %v322_v46 = vld [vmem:[#allocation5 + $0x2d8] sm:$0xff] }
  0x9e   : > { %1064 = vmatprep.subr.bf16.mxu1 %v2331_v52  ;;  %v2271_v52 = vcombine.high %v266_v47, %v270_v48 }
  0xa0   : > { %1024 = vmatpush1.bf16.msra.mxu0 %v2328_v55  ;;  %v274_v55 = vld [vmem:[#allocation5 + $0x158] sm:$0xff] }
  0xa1   : > { %1065 = vmatpush1.bf16.msra.mxu1 %v2330_v58  ;;  %1025 = vmatprep.subr.bf16.mxu0 %v2337_v59  ;;  %v2270_v58 = vcombine.low %v266_v47, %v270_v48  ;;  %v2277_v59 = vcombine.high %v273_v53, %v277_v54  ;;  %v333_v47 = vld [vmem:[#allocation5 + $0x330] sm:$0xff]  ;;  %v330_v48 = vld [vmem:[#allocation5 + $0x318] sm:$0xff] }
  0xa2   : > { %1066 = vmatprep.subr.bf16.mxu1 %v2339_v60  ;;  %v2279_v60 = vcombine.high %v274_v55, %v278_v56  ;;  %v337_v54 = vld [vmem:[#allocation5 + $0x350] sm:$0xff] }
  0xa4   : > { %1026 = vmatpush1.bf16.msra.mxu0 %v2336_v63  ;;  %v282_v63 = vld [vmem:[#allocation5 + $0x198] sm:$0xff] }
  0xa5   : > { %1067 = vmatpush1.bf16.msra.mxu1 %v2338_v4  ;;  %1027 = vmatprep.subr.bf16.mxu0 %v2345_v5  ;;  %v2278_v4 = vcombine.low %v274_v55, %v278_v56  ;;  %v2285_v5 = vcombine.high %v281_v61, %v285_v62  ;;  %v341_v55 = vld [vmem:[#allocation5 + $0x370] sm:$0xff]  ;;  %v338_v56 = vld [vmem:[#allocation5 + $0x358] sm:$0xff] }
  0xa6   : > { %1068 = vmatprep.subr.bf16.mxu1 %v2347_v6  ;;  %v2287_v6 = vcombine.high %v282_v63, %v286_v2 }
  0xa8   : > { %1028 = vmatpush1.bf16.msra.mxu0 %v2344_v9  ;;  %v290_v9 = vld [vmem:[#allocation5 + $0x1d8] sm:$0xff] }
  0xa9   : > { %1069 = vmatpush1.bf16.msra.mxu1 %v2346_v10  ;;  %1029 = vmatprep.subr.bf16.mxu0 %v2353_v11  ;;  %v294_v10 = vld [vmem:[#allocation5 + $0x1f8] sm:$0xff]  ;;  %v2284_v11 = vcombine.low %v281_v61, %v285_v62  ;;  %v345_v62 = vld [vmem:[#allocation5 + $0x390] sm:$0xff] }
  0xaa   : > { %1070 = vmatprep.subr.bf16.mxu1 %v2355_v12  ;;  %v2286_v12 = vcombine.low %v282_v63, %v286_v2  ;;  %v349_v63 = vld [vmem:[#allocation5 + $0x3b0] sm:$0xff]  ;;  %v346_v2 = vld [vmem:[#allocation5 + $0x398] sm:$0xff] }
  0xac   : > { %1030 = vmatpush1.bf16.msra.mxu0 %v2352_v13  ;;  %v2293_v13 = vcombine.high %v289_v7, %v293_v8 }
  0xad   : > { %1071 = vmatpush1.bf16.msra.mxu1 %v2354_v14  ;;  %1081 = vmatprep.subr.bf16.mxu0 %v2237_v15  ;;  %v2295_v14 = vcombine.high %v290_v9, %v294_v10  ;;  %v297_v15 = vld [vmem:[#allocation5 + $0x210] sm:$0xff] }
  0xae   : > { %1122 = vmatprep.subr.bf16.mxu1 %v2239_v16  ;;  %v301_v16 = vld [vmem:[#allocation5 + $0x230] sm:$0xff] }
  0xfd   : > { %v222_v17 = vpop.xlane.xlu0 %221 }
  0xfe   : > { %v224_v18 = vmul.f32 0.00390625, %v222_v17  ;;  %v298_v17 = vld [vmem:[#allocation5 + $0x218] sm:$0xff] }
 0x100   : > { %v225_v19 = vadd.f32 1e-06, %v224_v18  ;;  %v302_v18 = vld [vmem:[#allocation5 + $0x238] sm:$0xff] }
 0x101   : > { %v2302_v35 = vcombine.low %v298_v17, %v302_v18 }
 0x102   : > { %2758 = vrsqrt.f32 %v225_v19  ;;  %v2292_v19 = vcombine.low %v289_v7, %v293_v8  ;;  %v353_v8 = vld [vmem:[#allocation5 + $0x3d0] sm:$0xff] }
 0x10c   : > { %v2759_v20 = vpop.eup %2758 }
 0x10d   : > { %v228_v21 = vmul.f32 %v2759_v20, %v3137_v1  ;;  %v227_v22 = vmul.f32 %v2759_v20, %v3134_v0  ;;  %v2244_v0 = vcombine.low %v241_v23, %v245_v24  ;;  %v2246_v1 = vcombine.low %v242_v29, %v246_v30  ;;  %v305_v23 = vld [vmem:[#allocation5 + $0x250] sm:$0xff]  ;;  %v306_v29 = vld [vmem:[#allocation5 + $0x258] sm:$0xff] }
 0x10e   : > { %v2294_v20 = vcombine.low %v290_v9, %v294_v10  ;;  %v309_v24 = vld [vmem:[#allocation5 + $0x270] sm:$0xff]  ;;  %v310_v30 = vld [vmem:[#allocation5 + $0x278] sm:$0xff] }
 0x10f   : > { %v230_v31 = vpack.c.bf16 %v228_v21, %v228_v21  ;;  %v3161_v34 = vpack.c.bf16 %v227_v22, %v227_v22  ;;  %v2301_v21 = vcombine.high %v297_v15, %v301_v16  ;;  %v2303_v22 = vcombine.high %v298_v17, %v302_v18  ;;  %v357_v9 = vld [vmem:[#allocation5 + $0x3f0] sm:$0xff]  ;;  %v354_v10 = vld [vmem:[#allocation5 + $0x3d8] sm:$0xff]  ;;  %v2568_v18 = vld [vmem:[#allocation7 + $0x4] ss:$8 sps:$4 sm:$0xff]  }
 0x111   : > { %1031 = vmatprep.mubr.bf16.mxu0 %v230_v31  ;;  %1072 = vmatprep.mubr.bf16.mxu1 %v230_v31 }
 0x112   : > { %1032 = vmatmul.mubr.bf16.vlgmr.msra.gmra.mrb[0].mxu0 %v3161_v34  ;;  %1073 = vmatmul.mubr.bf16.vlgmr.msra.gmra.mrb[0].mxu1 %v3161_v34 }
 0x113   : > { %1082 = vmatpush1.bf16.msra.mxu0 %v2236_v32  ;;  %1123 = vmatpush1.bf16.msra.mxu1 %v2238_v33  ;;  %v265_v32 = vld [vmem:[#allocation5 + $0x110] sm:$0xff] }
 0x114   : > { %1113 = vmatprep.mubr.bf16.mxu0 %v230_v31  ;;  %1154 = vmatprep.mubr.bf16.mxu1 %v230_v31  ;;  %v269_v33 = vld [vmem:[#allocation5 + $0x130] sm:$0xff]  ;;  %v2300_v31 = vcombine.low %v297_v15, %v301_v16  ;;  %v2356_v16 = vcombine.low %v353_v8, %v357_v9 }
 0x115   : > { %1083 = vmatprep.subr.bf16.mxu0 %v2245_v36  ;;  %1124 = vmatprep.subr.bf16.mxu1 %v2247_v37  ;;  %v2269_v51 = vcombine.high %v265_v32, %v269_v33  ;;  %v2268_v57 = vcombine.low %v265_v32, %v269_v33  ;;  %v2309_v36 = vcombine.high %v305_v23, %v309_v24  ;;  %v329_v33 = vld [vmem:[#allocation5 + $0x310] sm:$0xff] }
 0x116   : > { %v2311_v37 = vcombine.high %v306_v29, %v310_v30 }
 0x117   : > { %1084 = vmatpush1.bf16.msra.mxu0 %v2244_v0  ;;  %1125 = vmatpush1.bf16.msra.mxu1 %v2246_v1  ;;  %v318_v0 = vld [vmem:[#allocation5 + $0x2b8] sm:$0xff]  ;;  %v2308_v1 = vcombine.low %v305_v23, %v309_v24 }
 0x118   : > { %1085 = vmatprep.subr.bf16.mxu0 %v2253_v41  ;;  %1126 = vmatprep.subr.bf16.mxu1 %v2255_v42  ;;  %v2310_v41 = vcombine.low %v306_v29, %v310_v30  ;;  %v2317_v42 = vcombine.high %v313_v38, %v317_v39  ;;  %v2319_v43 = vcombine.high %v314_v40, %v318_v0  ;;  %v2577_v23 = vld [vmem:[#allocation7 + $0x114] ss:$8 sps:$4 sm:$0xff]   ;;  %v2572_v24 = vld [vmem:[#allocation7 + $0x10] ss:$8 sps:$4 sm:$0xff]   ;;  %v2580_v30 = vld [vmem:[#allocation7 + $0x24] ss:$8 sps:$4 sm:$0xff]  }
 0x119   : > { %v2575_v29 = vld [vmem:[#allocation7 + $0x110] ss:$8 sps:$4 sm:$0xff]  }
 0x11b   : > { %1086 = vmatpush1.bf16.msra.mxu0 %v2252_v25  ;;  %1127 = vmatpush1.bf16.msra.mxu1 %v2254_v26  ;;  %v326_v25 = vld [vmem:[#allocation5 + $0x2f8] sm:$0xff]  ;;  %v2316_v26 = vcombine.low %v313_v38, %v317_v39 }
 0x11c   : > { %1087 = vmatprep.subr.bf16.mxu0 %v2261_v27  ;;  %1128 = vmatprep.subr.bf16.mxu1 %v2263_v28  ;;  %v2318_v27 = vcombine.low %v314_v40, %v318_v0  ;;  %v2325_v28 = vcombine.high %v321_v44, %v325_v45  ;;  %v2327_v32 = vcombine.high %v322_v46, %v326_v25  ;;  %v2589_v38 = vld [vmem:[#allocation7 + $0x134] ss:$8 sps:$4 sm:$0xff]   ;;  %v2584_v39 = vld [vmem:[#allocation7 + $0x30] ss:$8 sps:$4 sm:$0xff]   ;;  %v2592_v40 = vld [vmem:[#allocation7 + $0x44] ss:$8 sps:$4 sm:$0xff]  }
 0x11d   : > { %v2595_v0 = vld [vmem:[#allocation7 + $0x144] ss:$8 sps:$4 sm:$0xff]  }
 0x11f   : > { %1088 = vmatpush1.bf16.msra.mxu0 %v2260_v49  ;;  %1129 = vmatpush1.bf16.msra.mxu1 %v2262_v50  ;;  %v334_v49 = vld [vmem:[#allocation5 + $0x338] sm:$0xff]  ;;  %v2324_v50 = vcombine.low %v321_v44, %v325_v45 }
 0x120   : > { %1089 = vmatprep.subr.bf16.mxu0 %v2269_v51  ;;  %1130 = vmatprep.subr.bf16.mxu1 %v2271_v52  ;;  %v2326_v51 = vcombine.low %v322_v46, %v326_v25  ;;  %v2333_v52 = vcombine.high %v329_v33, %v333_v47  ;;  %v2335_v53 = vcombine.high %v330_v48, %v334_v49  ;;  %v2596_v44 = vld [vmem:[#allocation7 + $0x50] ss:$8 sps:$4 sm:$0xff]   ;;  %v2604_v46 = vld [vmem:[#allocation7 + $0x64] ss:$8 sps:$4 sm:$0xff]  }
 0x121   : > { %v2599_v45 = vld [vmem:[#allocation7 + $0x150] ss:$8 sps:$4 sm:$0xff]   ;;  %v2607_v25 = vld [vmem:[#allocation7 + $0x164] ss:$8 sps:$4 sm:$0xff]  }
 0x123   : > { %1090 = vmatpush1.bf16.msra.mxu0 %v2268_v57  ;;  %1131 = vmatpush1.bf16.msra.mxu1 %v2270_v58  ;;  %v342_v57 = vld [vmem:[#allocation5 + $0x378] sm:$0xff]  ;;  %v2332_v58 = vcombine.low %v329_v33, %v333_v47 }
 0x124   : > { %1091 = vmatprep.subr.bf16.mxu0 %v2277_v59  ;;  %1132 = vmatprep.subr.bf16.mxu1 %v2279_v60  ;;  %v2334_v59 = vcombine.low %v330_v48, %v334_v49  ;;  %v2341_v60 = vcombine.high %v337_v54, %v341_v55  ;;  %v2343_v61 = vcombine.high %v338_v56, %v342_v57  ;;  %v2608_v33 = vld [vmem:[#allocation7 + $0x70] ss:$8 sps:$4 sm:$0xff]   ;;  %v2616_v48 = vld [vmem:[#allocation7 + $0x84] ss:$8 sps:$4 sm:$0xff]  }
 0x125   : > { %v2611_v47 = vld [vmem:[#allocation7 + $0x170] ss:$8 sps:$4 sm:$0xff]   ;;  %v2619_v49 = vld [vmem:[#allocation7 + $0x184] ss:$8 sps:$4 sm:$0xff]  }
 0x127   : > { %1092 = vmatpush1.bf16.msra.mxu0 %v2276_v3  ;;  %1133 = vmatpush1.bf16.msra.mxu1 %v2278_v4  ;;  %v350_v3 = vld [vmem:[#allocation5 + $0x3b8] sm:$0xff]  ;;  %v2340_v4 = vcombine.low %v337_v54, %v341_v55 }
 0x128   : > { %1093 = vmatprep.subr.bf16.mxu0 %v2285_v5  ;;  %1134 = vmatprep.subr.bf16.mxu1 %v2287_v6  ;;  %v2342_v5 = vcombine.low %v338_v56, %v342_v57  ;;  %v2349_v6 = vcombine.high %v345_v62, %v349_v63  ;;  %v2351_v7 = vcombine.high %v346_v2, %v350_v3  ;;  %v2620_v54 = vld [vmem:[#allocation7 + $0x90] ss:$8 sps:$4 sm:$0xff]   ;;  %v2628_v56 = vld [vmem:[#allocation7 + $0xa4] ss:$8 sps:$4 sm:$0xff]  }
 0x129   : > { %v2623_v55 = vld [vmem:[#allocation7 + $0x190] ss:$8 sps:$4 sm:$0xff]   ;;  %v2631_v57 = vld [vmem:[#allocation7 + $0x1a4] ss:$8 sps:$4 sm:$0xff]  }
 0x12b   : > { %1094 = vmatpush1.bf16.msra.mxu0 %v2284_v11  ;;  %1135 = vmatpush1.bf16.msra.mxu1 %v2286_v12  ;;  %v358_v11 = vld [vmem:[#allocation5 + $0x3f8] sm:$0xff]  ;;  %v2348_v12 = vcombine.low %v345_v62, %v349_v63 }
 0x12c   : > { %1095 = vmatprep.subr.bf16.mxu0 %v2293_v13  ;;  %1136 = vmatprep.subr.bf16.mxu1 %v2295_v14  ;;  %v2350_v13 = vcombine.low %v346_v2, %v350_v3  ;;  %v2357_v14 = vcombine.high %v353_v8, %v357_v9  ;;  %v2359_v15 = vcombine.high %v354_v10, %v358_v11  ;;  %v2632_v62 = vld [vmem:[#allocation7 + $0xb0] ss:$8 sps:$4 sm:$0xff]   ;;  %v2640_v2 = vld [vmem:[#allocation7 + $0xc4] ss:$8 sps:$4 sm:$0xff]  }
 0x12d   : > { %v2358_v17 = vcombine.low %v354_v10, %v358_v11  ;;  %v2635_v63 = vld [vmem:[#allocation7 + $0x1b0] ss:$8 sps:$4 sm:$0xff]   ;;  %v2643_v3 = vld [vmem:[#allocation7 + $0x1c4] ss:$8 sps:$4 sm:$0xff]  }
 0x12e   : > { %v2644_v8 = vld [vmem:[#allocation7 + $0xd0] ss:$8 sps:$4 sm:$0xff]   ;;  %v2652_v10 = vld [vmem:[#allocation7 + $0xe4] ss:$8 sps:$4 sm:$0xff]  }
 0x12f   : > { %1096 = vmatpush1.bf16.msra.mxu0 %v2292_v19  ;;  %1137 = vmatpush1.bf16.msra.mxu1 %v2294_v20  ;;  %v2571_v19 = vld [vmem:[#allocation7 + $0x104] ss:$8 sps:$4 sm:$0xff]   ;;  %v2566_v20 = vld [vmem:[#allocation7] ss:$8 sps:$4 sm:$0xff]   ;;  %v2647_v9 = vld [vmem:[#allocation7 + $0x1d0] ss:$8 sps:$4 sm:$0xff]  }
 0x130   : > { %1097 = vmatprep.subr.bf16.mxu0 %v2301_v21  ;;  %1138 = vmatprep.subr.bf16.mxu1 %v2303_v22  ;;  %v2569_v21 = vld [vmem:[#allocation7 + $0x100] ss:$8 sps:$4 sm:$0xff]   ;;  %v2574_v22 = vld [vmem:[#allocation7 + $0x14] ss:$8 sps:$4 sm:$0xff]   ;;  %v2655_v11 = vld [vmem:[#allocation7 + $0x1e4] ss:$8 sps:$4 sm:$0xff]  }
 0x133   : > { %1098 = vmatpush1.bf16.msra.mxu0 %v2300_v31  ;;  %1139 = vmatpush1.bf16.msra.mxu1 %v2302_v35  ;;  %v2583_v31 = vld [vmem:[#allocation7 + $0x124] ss:$8 sps:$4 sm:$0xff]   ;;  %v2578_v35 = vld [vmem:[#allocation7 + $0x20] ss:$8 sps:$4 sm:$0xff]  }
 0x134   : > { %1099 = vmatprep.subr.bf16.mxu0 %v2309_v36  ;;  %1140 = vmatprep.subr.bf16.mxu1 %v2311_v37  ;;  %v2581_v36 = vld [vmem:[#allocation7 + $0x120] ss:$8 sps:$4 sm:$0xff]   ;;  %v2586_v37 = vld [vmem:[#allocation7 + $0x34] ss:$8 sps:$4 sm:$0xff]  }
 0x137   : > { %1100 = vmatpush1.bf16.msra.mxu0 %v2308_v1  ;;  %1141 = vmatpush1.bf16.msra.mxu1 %v2310_v41  ;;  %v2590_v1 = vld [vmem:[#allocation7 + $0x40] ss:$8 sps:$4 sm:$0xff]  }
 0x138   : > { %1101 = vmatprep.subr.bf16.mxu0 %v2317_v42  ;;  %1142 = vmatprep.subr.bf16.mxu1 %v2319_v43  ;;  %v2593_v41 = vld [vmem:[#allocation7 + $0x140] ss:$8 sps:$4 sm:$0xff]   ;;  %v2598_v42 = vld [vmem:[#allocation7 + $0x54] ss:$8 sps:$4 sm:$0xff]  }
 0x139   : > { %v2601_v43 = vld [vmem:[#allocation7 + $0x154] ss:$8 sps:$4 sm:$0xff]  }
 0x13b   : > { %1102 = vmatpush1.bf16.msra.mxu0 %v2316_v26  ;;  %1143 = vmatpush1.bf16.msra.mxu1 %v2318_v27  ;;  %v2602_v26 = vld [vmem:[#allocation7 + $0x60] ss:$8 sps:$4 sm:$0xff]  }
 0x13c   : > { %1103 = vmatprep.subr.bf16.mxu0 %v2325_v28  ;;  %1144 = vmatprep.subr.bf16.mxu1 %v2327_v32  ;;  %v2605_v27 = vld [vmem:[#allocation7 + $0x160] ss:$8 sps:$4 sm:$0xff]   ;;  %v2610_v28 = vld [vmem:[#allocation7 + $0x74] ss:$8 sps:$4 sm:$0xff]  }
 0x13d   : > { %v2613_v32 = vld [vmem:[#allocation7 + $0x174] ss:$8 sps:$4 sm:$0xff]  }
 0x13f   : > { %1104 = vmatpush1.bf16.msra.mxu0 %v2324_v50  ;;  %1145 = vmatpush1.bf16.msra.mxu1 %v2326_v51  ;;  %v2614_v50 = vld [vmem:[#allocation7 + $0x80] ss:$8 sps:$4 sm:$0xff]  }
 0x140   : > { %1105 = vmatprep.subr.bf16.mxu0 %v2333_v52  ;;  %1146 = vmatprep.subr.bf16.mxu1 %v2335_v53  ;;  %v2617_v51 = vld [vmem:[#allocation7 + $0x180] ss:$8 sps:$4 sm:$0xff]   ;;  %v2622_v52 = vld [vmem:[#allocation7 + $0x94] ss:$8 sps:$4 sm:$0xff]  }
 0x141   : > { %v2625_v53 = vld [vmem:[#allocation7 + $0x194] ss:$8 sps:$4 sm:$0xff]  }
 0x143   : > { %1106 = vmatpush1.bf16.msra.mxu0 %v2332_v58  ;;  %1147 = vmatpush1.bf16.msra.mxu1 %v2334_v59  ;;  %v2626_v58 = vld [vmem:[#allocation7 + $0xa0] ss:$8 sps:$4 sm:$0xff]  }
 0x144   : > { %1107 = vmatprep.subr.bf16.mxu0 %v2341_v60  ;;  %1148 = vmatprep.subr.bf16.mxu1 %v2343_v61  ;;  %v2629_v59 = vld [vmem:[#allocation7 + $0x1a0] ss:$8 sps:$4 sm:$0xff]   ;;  %v2634_v60 = vld [vmem:[#allocation7 + $0xb4] ss:$8 sps:$4 sm:$0xff]  }
 0x145   : > { %v2637_v61 = vld [vmem:[#allocation7 + $0x1b4] ss:$8 sps:$4 sm:$0xff]  }
 0x147   : > { %1108 = vmatpush1.bf16.msra.mxu0 %v2340_v4  ;;  %1149 = vmatpush1.bf16.msra.mxu1 %v2342_v5  ;;  %v2638_v4 = vld [vmem:[#allocation7 + $0xc0] ss:$8 sps:$4 sm:$0xff]  }
 0x148   : > { %1109 = vmatprep.subr.bf16.mxu0 %v2349_v6  ;;  %1150 = vmatprep.subr.bf16.mxu1 %v2351_v7  ;;  %v2641_v5 = vld [vmem:[#allocation7 + $0x1c0] ss:$8 sps:$4 sm:$0xff]   ;;  %v2646_v6 = vld [vmem:[#allocation7 + $0xd4] ss:$8 sps:$4 sm:$0xff]  }
 0x149   : > { %v2649_v7 = vld [vmem:[#allocation7 + $0x1d4] ss:$8 sps:$4 sm:$0xff]  }
 0x14b   : > { %1110 = vmatpush1.bf16.msra.mxu0 %v2348_v12  ;;  %1151 = vmatpush1.bf16.msra.mxu1 %v2350_v13  ;;  %v2650_v12 = vld [vmem:[#allocation7 + $0xe0] ss:$8 sps:$4 sm:$0xff]  }
 0x14c   : > { %1111 = vmatprep.subr.bf16.mxu0 %v2357_v14  ;;  %1152 = vmatprep.subr.bf16.mxu1 %v2359_v15  ;;  %v2653_v13 = vld [vmem:[#allocation7 + $0x1e0] ss:$8 sps:$4 sm:$0xff]   ;;  %v2658_v14 = vld [vmem:[#allocation7 + $0xf4] ss:$8 sps:$4 sm:$0xff]  }
 0x14d   : > { %v2661_v15 = vld [vmem:[#allocation7 + $0x1f4] ss:$8 sps:$4 sm:$0xff]  }
 0x14f   : > { %1112 = vmatpush1.bf16.msra.mxu0 %v2356_v16  ;;  %1153 = vmatpush1.bf16.msra.mxu1 %v2358_v17  ;;  %v2656_v16 = vld [vmem:[#allocation7 + $0xf0] ss:$8 sps:$4 sm:$0xff]  }
 0x150   : > { %1947 = vmatprep.subr.bf16.mxu0 %v2568_v18  ;;  %1988 = vmatprep.subr.bf16.mxu1 %v2571_v19  ;;  %v2659_v17 = vld [vmem:[#allocation7 + $0x1f0] ss:$8 sps:$4 sm:$0xff]   ;;  %v2664_v18 = vld [vmem:[#allocation7 + $0x204] ss:$8 sps:$4 sm:$0xff]  }
 0x151   : > { %v2667_v19 = vld [vmem:[#allocation7 + $0x304] ss:$8 sps:$4 sm:$0xff]  }
 0x152   : > { %1114 = vmatmul.mubr.bf16.vlgmr.msra.gmra.mrb[4].mxu0 %v3161_v34  ;;  %1155 = vmatmul.mubr.bf16.vlgmr.msra.gmra.mrb[4].mxu1 %v3161_v34  ;;  %v2587_v34 = vld [vmem:[#allocation7 + $0x130] ss:$8 sps:$4 sm:$0xff]  }
 0x153   : > { %1948 = vmatpush1.bf16.msra.mxu0 %v2566_v20  ;;  %1989 = vmatpush1.bf16.msra.mxu1 %v2569_v21 }
 0x154   : > { %1949 = vmatprep.subr.bf16.mxu0 %v2574_v22  ;;  %1990 = vmatprep.subr.bf16.mxu1 %v2577_v23 }
 0x157   : > { %1950 = vmatpush1.bf16.msra.mxu0 %v2572_v24  ;;  %1991 = vmatpush1.bf16.msra.mxu1 %v2575_v29 }
 0x158   : > { %1951 = vmatprep.subr.bf16.mxu0 %v2580_v30  ;;  %1992 = vmatprep.subr.bf16.mxu1 %v2583_v31 }
 0x15b   : > { %1952 = vmatpush1.bf16.msra.mxu0 %v2578_v35  ;;  %1993 = vmatpush1.bf16.msra.mxu1 %v2581_v36 }
 0x15c   : > { %1953 = vmatprep.subr.bf16.mxu0 %v2586_v37  ;;  %1994 = vmatprep.subr.bf16.mxu1 %v2589_v38 }
 0x15f   : > { %1954 = vmatpush1.bf16.msra.mxu0 %v2584_v39  ;;  %1995 = vmatpush1.bf16.msra.mxu1 %v2587_v34 }
 0x160   : > { %1955 = vmatprep.subr.bf16.mxu0 %v2592_v40  ;;  %1996 = vmatprep.subr.bf16.mxu1 %v2595_v0  ;;  %v2662_v40 = vld [vmem:[#allocation7 + $0x200] ss:$8 sps:$4 sm:$0xff]  }
 0x161   : > { %v2665_v0 = vld [vmem:[#allocation7 + $0x300] ss:$8 sps:$4 sm:$0xff]  }
 0x163   : > { %1956 = vmatpush1.bf16.msra.mxu0 %v2590_v1  ;;  %1997 = vmatpush1.bf16.msra.mxu1 %v2593_v41 }
 0x164   : > { %1957 = vmatprep.subr.bf16.mxu0 %v2598_v42  ;;  %1998 = vmatprep.subr.bf16.mxu1 %v2601_v43  ;;  %v2670_v42 = vld [vmem:[#allocation7 + $0x214] ss:$8 sps:$4 sm:$0xff]  }
 0x165   : > { %v2673_v43 = vld [vmem:[#allocation7 + $0x314] ss:$8 sps:$4 sm:$0xff]  }
 0x167   : > { %1958 = vmatpush1.bf16.msra.mxu0 %v2596_v44  ;;  %1999 = vmatpush1.bf16.msra.mxu1 %v2599_v45  ;;  %v2668_v44 = vld [vmem:[#allocation7 + $0x210] ss:$8 sps:$4 sm:$0xff]  }
 0x168   : > { %1959 = vmatprep.subr.bf16.mxu0 %v2604_v46  ;;  %2000 = vmatprep.subr.bf16.mxu1 %v2607_v25  ;;  %v2671_v45 = vld [vmem:[#allocation7 + $0x310] ss:$8 sps:$4 sm:$0xff]   ;;  %v2676_v46 = vld [vmem:[#allocation7 + $0x224] ss:$8 sps:$4 sm:$0xff]  }
 0x169   : > { %v2679_v25 = vld [vmem:[#allocation7 + $0x324] ss:$8 sps:$4 sm:$0xff]  }
 0x16b   : > { %1960 = vmatpush1.bf16.msra.mxu0 %v2602_v26  ;;  %2001 = vmatpush1.bf16.msra.mxu1 %v2605_v27  ;;  %v2674_v26 = vld [vmem:[#allocation7 + $0x220] ss:$8 sps:$4 sm:$0xff]  }
 0x16c   : > { %1961 = vmatprep.subr.bf16.mxu0 %v2610_v28  ;;  %2002 = vmatprep.subr.bf16.mxu1 %v2613_v32  ;;  %v2677_v27 = vld [vmem:[#allocation7 + $0x320] ss:$8 sps:$4 sm:$0xff]   ;;  %v2682_v28 = vld [vmem:[#allocation7 + $0x234] ss:$8 sps:$4 sm:$0xff]  }
 0x16d   : > { %v2685_v32 = vld [vmem:[#allocation7 + $0x334] ss:$8 sps:$4 sm:$0xff]  }
 0x16f   : > { %1962 = vmatpush1.bf16.msra.mxu0 %v2608_v33  ;;  %2003 = vmatpush1.bf16.msra.mxu1 %v2611_v47  ;;  %v2680_v33 = vld [vmem:[#allocation7 + $0x230] ss:$8 sps:$4 sm:$0xff]  }
 0x170   : > { %1963 = vmatprep.subr.bf16.mxu0 %v2616_v48  ;;  %2004 = vmatprep.subr.bf16.mxu1 %v2619_v49  ;;  %v2683_v47 = vld [vmem:[#allocation7 + $0x330] ss:$8 sps:$4 sm:$0xff]   ;;  %v2688_v48 = vld [vmem:[#allocation7 + $0x244] ss:$8 sps:$4 sm:$0xff]  }
 0x171   : > { %v2691_v49 = vld [vmem:[#allocation7 + $0x344] ss:$8 sps:$4 sm:$0xff]  }
 0x173   : > { %1964 = vmatpush1.bf16.msra.mxu0 %v2614_v50  ;;  %2005 = vmatpush1.bf16.msra.mxu1 %v2617_v51  ;;  %v2686_v50 = vld [vmem:[#allocation7 + $0x240] ss:$8 sps:$4 sm:$0xff]  }
 0x174   : > { %1965 = vmatprep.subr.bf16.mxu0 %v2622_v52  ;;  %2006 = vmatprep.subr.bf16.mxu1 %v2625_v53  ;;  %v2689_v51 = vld [vmem:[#allocation7 + $0x340] ss:$8 sps:$4 sm:$0xff]   ;;  %v2694_v52 = vld [vmem:[#allocation7 + $0x254] ss:$8 sps:$4 sm:$0xff]  }
 0x175   : > { %v2697_v53 = vld [vmem:[#allocation7 + $0x354] ss:$8 sps:$4 sm:$0xff]  }
 0x177   : > { %1966 = vmatpush1.bf16.msra.mxu0 %v2620_v54  ;;  %2007 = vmatpush1.bf16.msra.mxu1 %v2623_v55  ;;  %v2692_v54 = vld [vmem:[#allocation7 + $0x250] ss:$8 sps:$4 sm:$0xff]  }
 0x178   : > { %1967 = vmatprep.subr.bf16.mxu0 %v2628_v56  ;;  %2008 = vmatprep.subr.bf16.mxu1 %v2631_v57  ;;  %v2695_v55 = vld [vmem:[#allocation7 + $0x350] ss:$8 sps:$4 sm:$0xff]   ;;  %v2700_v56 = vld [vmem:[#allocation7 + $0x264] ss:$8 sps:$4 sm:$0xff]  }
 0x179   : > { %v2703_v57 = vld [vmem:[#allocation7 + $0x364] ss:$8 sps:$4 sm:$0xff]  }
 0x17b   : > { %1968 = vmatpush1.bf16.msra.mxu0 %v2626_v58  ;;  %2009 = vmatpush1.bf16.msra.mxu1 %v2629_v59  ;;  %v2698_v58 = vld [vmem:[#allocation7 + $0x260] ss:$8 sps:$4 sm:$0xff]  }
 0x17c   : > { %1969 = vmatprep.subr.bf16.mxu0 %v2634_v60  ;;  %2010 = vmatprep.subr.bf16.mxu1 %v2637_v61  ;;  %v2701_v59 = vld [vmem:[#allocation7 + $0x360] ss:$8 sps:$4 sm:$0xff]   ;;  %v2706_v60 = vld [vmem:[#allocation7 + $0x274] ss:$8 sps:$4 sm:$0xff]  }
 0x17d   : > { %v2709_v61 = vld [vmem:[#allocation7 + $0x374] ss:$8 sps:$4 sm:$0xff]  }
 0x17f   : > { %1970 = vmatpush1.bf16.msra.mxu0 %v2632_v62  ;;  %2011 = vmatpush1.bf16.msra.mxu1 %v2635_v63  ;;  %v2704_v62 = vld [vmem:[#allocation7 + $0x270] ss:$8 sps:$4 sm:$0xff]  }
 0x180   : > { %1971 = vmatprep.subr.bf16.mxu0 %v2640_v2  ;;  %2012 = vmatprep.subr.bf16.mxu1 %v2643_v3  ;;  %v2707_v63 = vld [vmem:[#allocation7 + $0x370] ss:$8 sps:$4 sm:$0xff]   ;;  %v2712_v2 = vld [vmem:[#allocation7 + $0x284] ss:$8 sps:$4 sm:$0xff]  }
 0x181   : > { %v2715_v3 = vld [vmem:[#allocation7 + $0x384] ss:$8 sps:$4 sm:$0xff]  }
 0x183   : > { %1972 = vmatpush1.bf16.msra.mxu0 %v2638_v4  ;;  %2013 = vmatpush1.bf16.msra.mxu1 %v2641_v5  ;;  %v2710_v4 = vld [vmem:[#allocation7 + $0x280] ss:$8 sps:$4 sm:$0xff]  }
 0x184   : > { %1973 = vmatprep.subr.bf16.mxu0 %v2646_v6  ;;  %2014 = vmatprep.subr.bf16.mxu1 %v2649_v7  ;;  %v2713_v5 = vld [vmem:[#allocation7 + $0x380] ss:$8 sps:$4 sm:$0xff]   ;;  %v2718_v6 = vld [vmem:[#allocation7 + $0x294] ss:$8 sps:$4 sm:$0xff]  }
 0x185   : > { %v2721_v7 = vld [vmem:[#allocation7 + $0x394] ss:$8 sps:$4 sm:$0xff]  }
 0x187   : > { %1974 = vmatpush1.bf16.msra.mxu0 %v2644_v8  ;;  %2015 = vmatpush1.bf16.msra.mxu1 %v2647_v9  ;;  %v2716_v8 = vld [vmem:[#allocation7 + $0x290] ss:$8 sps:$4 sm:$0xff]  }
 0x188   : > { %1975 = vmatprep.subr.bf16.mxu0 %v2652_v10  ;;  %2016 = vmatprep.subr.bf16.mxu1 %v2655_v11  ;;  %v2719_v9 = vld [vmem:[#allocation7 + $0x390] ss:$8 sps:$4 sm:$0xff]   ;;  %v2724_v10 = vld [vmem:[#allocation7 + $0x2a4] ss:$8 sps:$4 sm:$0xff]  }
 0x189   : > { %v2727_v11 = vld [vmem:[#allocation7 + $0x3a4] ss:$8 sps:$4 sm:$0xff]  }
 0x18b   : > { %1976 = vmatpush1.bf16.msra.mxu0 %v2650_v12  ;;  %2017 = vmatpush1.bf16.msra.mxu1 %v2653_v13  ;;  %v2722_v12 = vld [vmem:[#allocation7 + $0x2a0] ss:$8 sps:$4 sm:$0xff]  }
 0x18c   : > { %1977 = vmatprep.subr.bf16.mxu0 %v2658_v14  ;;  %2018 = vmatprep.subr.bf16.mxu1 %v2661_v15  ;;  %v2725_v13 = vld [vmem:[#allocation7 + $0x3a0] ss:$8 sps:$4 sm:$0xff]   ;;  %v2730_v14 = vld [vmem:[#allocation7 + $0x2b4] ss:$8 sps:$4 sm:$0xff]  }
 0x18d   : > { %v2733_v15 = vld [vmem:[#allocation7 + $0x3b4] ss:$8 sps:$4 sm:$0xff]  }
 0x18f   : > { %1978 = vmatpush1.bf16.msra.mxu0 %v2656_v16  ;;  %2019 = vmatpush1.bf16.msra.mxu1 %v2659_v17  ;;  %v2728_v16 = vld [vmem:[#allocation7 + $0x2b0] ss:$8 sps:$4 sm:$0xff]  }
 0x190   : > { %2029 = vmatprep.subr.bf16.mxu0 %v2664_v18  ;;  %2070 = vmatprep.subr.bf16.mxu1 %v2667_v19  ;;  %v2731_v17 = vld [vmem:[#allocation7 + $0x3b0] ss:$8 sps:$4 sm:$0xff]   ;;  %v2736_v18 = vld [vmem:[#allocation7 + $0x2c4] ss:$8 sps:$4 sm:$0xff]  }
 0x191   : > { %v2739_v19 = vld [vmem:[#allocation7 + $0x3c4] ss:$8 sps:$4 sm:$0xff]  }
 0x1e5   : > { %v1033_v20 = vpop.f32.mrb[0].mxu0  ;;  %v1074_v21 = vpop.f32.mrb[0].mxu1 }
 0x1e6   : > { %v1163_v22 = vmax.f32 %v1033_v20, 0.0  ;;  %v1165_v23 = vmax.f32 %v1074_v21, 0.0  ;;  %v1035_v24 = vpop.f32.mrb[1].mxu0  ;;  %v1076_v29 = vpop.f32.mrb[1].mxu1  ;;  %v2734_v20 = vld [vmem:[#allocation7 + $0x2c0] ss:$8 sps:$4 sm:$0xff]  }
 0x1e7   : > { %v1164_v30 = vmax.f32 %v1035_v24, 0.0  ;;  %v1166_v31 = vmax.f32 %v1076_v29, 0.0  ;;  %v1037_v35 = vpop.f32.mrb[2].mxu0  ;;  %v1078_v36 = vpop.f32.mrb[2].mxu1  ;;  %v2737_v21 = vld [vmem:[#allocation7 + $0x3c0] ss:$8 sps:$4 sm:$0xff]  }
 0x1e8   : > { %v1038_v37 = vpop.f32.mrb[3].mxu0  ;;  %v1079_v38 = vpop.f32.mrb[3].mxu1  ;;  %v1171_v1 = vpack.c.bf16 %v1163_v22, %v1163_v22  ;;  %v1173_v41 = vpack.c.bf16 %v1165_v23, %v1165_v23  ;;  %v2742_v22 = vld [vmem:[#allocation7 + $0x2d4] ss:$8 sps:$4 sm:$0xff]   ;;  %v2740_v24 = vld [vmem:[#allocation7 + $0x2d0] ss:$8 sps:$4 sm:$0xff]  }
 0x1e9   : > { %v1172_v39 = vpack.c.bf16 %v1164_v30, %v1164_v30  ;;  %v1174_v34 = vpack.c.bf16 %v1166_v31, %v1166_v31  ;;  %v2745_v23 = vld [vmem:[#allocation7 + $0x3d4] ss:$8 sps:$4 sm:$0xff]   ;;  %v2743_v29 = vld [vmem:[#allocation7 + $0x3d0] ss:$8 sps:$4 sm:$0xff]   ;;  %v2748_v30 = vld [vmem:[#allocation7 + $0x2e4] ss:$8 sps:$4 sm:$0xff]  }
 0x1ea   : > { %v2751_v31 = vld [vmem:[#allocation7 + $0x3e4] ss:$8 sps:$4 sm:$0xff]   ;;  %v2746_v35 = vld [vmem:[#allocation7 + $0x2e0] ss:$8 sps:$4 sm:$0xff]   ;;  %v2754_v37 = vld [vmem:[#allocation7 + $0x2f4] ss:$8 sps:$4 sm:$0xff]  }
 0x1eb   : > { %1979 = vmatprep.mubr.bf16.mxu0 %v1172_v39  ;;  %2020 = vmatprep.mubr.bf16.mxu1 %v1174_v34  ;;  %v2749_v36 = vld [vmem:[#allocation7 + $0x3e0] ss:$8 sps:$4 sm:$0xff]   ;;  %v2757_v38 = vld [vmem:[#allocation7 + $0x3f4] ss:$8 sps:$4 sm:$0xff]  }
 0x1ec   : > { %1980 = vmatmul.mubr.bf16.vlgmr.msra.gmra.mrb[8].mxu0 %v1171_v1  ;;  %2021 = vmatmul.mubr.bf16.vlgmr.msra.gmra.mrb[8].mxu1 %v1173_v41 }
 0x1ed   : > { %2030 = vmatpush1.bf16.msra.mxu0 %v2662_v40  ;;  %2071 = vmatpush1.bf16.msra.mxu1 %v2665_v0  ;;  %v2752_v40 = vld [vmem:[#allocation7 + $0x2f0] ss:$8 sps:$4 sm:$0xff]  }
 0x1ee   : > { %2031 = vmatprep.subr.bf16.mxu0 %v2670_v42  ;;  %2072 = vmatprep.subr.bf16.mxu1 %v2673_v43  ;;  %v2755_v0 = vld [vmem:[#allocation7 + $0x3f0] ss:$8 sps:$4 sm:$0xff]  }
 0x1f1   : > { %2032 = vmatpush1.bf16.msra.mxu0 %v2668_v44  ;;  %2073 = vmatpush1.bf16.msra.mxu1 %v2671_v45 }
 0x1f2   : > { %2033 = vmatprep.subr.bf16.mxu0 %v2676_v46  ;;  %2074 = vmatprep.subr.bf16.mxu1 %v2679_v25 }
 0x1f5   : > { %2034 = vmatpush1.bf16.msra.mxu0 %v2674_v26  ;;  %2075 = vmatpush1.bf16.msra.mxu1 %v2677_v27 }
 0x1f6   : > { %2035 = vmatprep.subr.bf16.mxu0 %v2682_v28  ;;  %2076 = vmatprep.subr.bf16.mxu1 %v2685_v32 }
 0x1f9   : > { %2036 = vmatpush1.bf16.msra.mxu0 %v2680_v33  ;;  %2077 = vmatpush1.bf16.msra.mxu1 %v2683_v47 }
 0x1fa   : > { %2037 = vmatprep.subr.bf16.mxu0 %v2688_v48  ;;  %2078 = vmatprep.subr.bf16.mxu1 %v2691_v49 }
 0x1fd   : > { %2038 = vmatpush1.bf16.msra.mxu0 %v2686_v50  ;;  %2079 = vmatpush1.bf16.msra.mxu1 %v2689_v51 }
 0x1fe   : > { %2039 = vmatprep.subr.bf16.mxu0 %v2694_v52  ;;  %2080 = vmatprep.subr.bf16.mxu1 %v2697_v53 }
 0x201   : > { %2040 = vmatpush1.bf16.msra.mxu0 %v2692_v54  ;;  %2081 = vmatpush1.bf16.msra.mxu1 %v2695_v55 }
 0x202   : > { %2041 = vmatprep.subr.bf16.mxu0 %v2700_v56  ;;  %2082 = vmatprep.subr.bf16.mxu1 %v2703_v57 }
 0x205   : > { %2042 = vmatpush1.bf16.msra.mxu0 %v2698_v58  ;;  %2083 = vmatpush1.bf16.msra.mxu1 %v2701_v59 }
 0x206   : > { %2043 = vmatprep.subr.bf16.mxu0 %v2706_v60  ;;  %2084 = vmatprep.subr.bf16.mxu1 %v2709_v61 }
 0x209   : > { %2044 = vmatpush1.bf16.msra.mxu0 %v2704_v62  ;;  %2085 = vmatpush1.bf16.msra.mxu1 %v2707_v63 }
 0x20a   : > { %2045 = vmatprep.subr.bf16.mxu0 %v2712_v2  ;;  %2086 = vmatprep.subr.bf16.mxu1 %v2715_v3 }
 0x20d   : > { %2046 = vmatpush1.bf16.msra.mxu0 %v2710_v4  ;;  %2087 = vmatpush1.bf16.msra.mxu1 %v2713_v5 }
 0x20e   : > { %2047 = vmatprep.subr.bf16.mxu0 %v2718_v6  ;;  %2088 = vmatprep.subr.bf16.mxu1 %v2721_v7 }
 0x211   : > { %2048 = vmatpush1.bf16.msra.mxu0 %v2716_v8  ;;  %2089 = vmatpush1.bf16.msra.mxu1 %v2719_v9  ;;  %v2760_v8 = vld [vmem:[%s3123_s30] sm:$0xff] }
 0x212   : > { %2049 = vmatprep.subr.bf16.mxu0 %v2724_v10  ;;  %2090 = vmatprep.subr.bf16.mxu1 %v2727_v11  ;;  %v2761_v10 = vld [vmem:[%s3123_s30 + $0x8] sm:$0xff] }
 0x215   : > { %2050 = vmatpush1.bf16.msra.mxu0 %v2722_v12  ;;  %2091 = vmatpush1.bf16.msra.mxu1 %v2725_v13 }
 0x216   : > { %2051 = vmatprep.subr.bf16.mxu0 %v2730_v14  ;;  %2092 = vmatprep.subr.bf16.mxu1 %v2733_v15 }
 0x219   : > { %2052 = vmatpush1.bf16.msra.mxu0 %v2728_v16  ;;  %2093 = vmatpush1.bf16.msra.mxu1 %v2731_v17 }
 0x21a   : > { %2053 = vmatprep.subr.bf16.mxu0 %v2736_v18  ;;  %2094 = vmatprep.subr.bf16.mxu1 %v2739_v19 }
 0x21d   : > { %2054 = vmatpush1.bf16.msra.mxu0 %v2734_v20  ;;  %2095 = vmatpush1.bf16.msra.mxu1 %v2737_v21 }
 0x21e   : > { %2055 = vmatprep.subr.bf16.mxu0 %v2742_v22  ;;  %2096 = vmatprep.subr.bf16.mxu1 %v2745_v23 }
 0x221   : > { %2056 = vmatpush1.bf16.msra.mxu0 %v2740_v24  ;;  %2097 = vmatpush1.bf16.msra.mxu1 %v2743_v29 }
 0x222   : > { %2057 = vmatprep.subr.bf16.mxu0 %v2748_v30  ;;  %2098 = vmatprep.subr.bf16.mxu1 %v2751_v31 }
 0x225   : > { %v1115_v39 = vpop.f32.mrb[4].mxu0  ;;  %v1156_v34 = vpop.f32.mrb[4].mxu1  ;;  %2058 = vmatpush1.bf16.msra.mxu0 %v2746_v35  ;;  %2099 = vmatpush1.bf16.msra.mxu1 %v2749_v36 }
 0x226   : > { %v1167_v1 = vmax.f32 %v1115_v39, 0.0  ;;  %v1169_v41 = vmax.f32 %v1156_v34, 0.0  ;;  %v1117_v42 = vpop.f32.mrb[5].mxu0  ;;  %v1158_v43 = vpop.f32.mrb[5].mxu1  ;;  %2059 = vmatprep.subr.bf16.mxu0 %v2754_v37  ;;  %2100 = vmatprep.subr.bf16.mxu1 %v2757_v38 }
 0x227   : > { %v1168_v44 = vmax.f32 %v1117_v42, 0.0  ;;  %v1170_v45 = vmax.f32 %v1158_v43, 0.0  ;;  %v1119_v46 = vpop.f32.mrb[6].mxu0  ;;  %v1160_v25 = vpop.f32.mrb[6].mxu1 }
 0x228   : > { %v1120_v26 = vpop.f32.mrb[7].mxu0  ;;  %v1161_v27 = vpop.f32.mrb[7].mxu1  ;;  %v1175_v33 = vpack.c.bf16 %v1167_v1, %v1167_v1  ;;  %v1177_v47 = vpack.c.bf16 %v1169_v41, %v1169_v41 }
 0x229   : > { %v1176_v28 = vpack.c.bf16 %v1168_v44, %v1168_v44  ;;  %v1178_v32 = vpack.c.bf16 %v1170_v45, %v1170_v45  ;;  %2060 = vmatpush1.bf16.msra.mxu0 %v2752_v40  ;;  %2101 = vmatpush1.bf16.msra.mxu1 %v2755_v0 }
 0x22b   : > { %2061 = vmatprep.mubr.bf16.mxu0 %v1176_v28  ;;  %2102 = vmatprep.mubr.bf16.mxu1 %v1178_v32 }
 0x22c   : > { %2062 = vmatmul.mubr.bf16.vlgmr.msra.gmra.mrb[12].mxu0 %v1175_v33  ;;  %2103 = vmatmul.mubr.bf16.vlgmr.msra.gmra.mrb[12].mxu1 %v1177_v47 }
 0x2bf   : > { %v1981_v48 = vpop.f32.mrb[8].mxu0  ;;  %v2022_v49 = vpop.f32.mrb[8].mxu1 }
 0x2c0   : > { %v2023_v50 = vadd.f32 %v2022_v49, %v1981_v48  ;;  %v1983_v51 = vpop.f32.mrb[9].mxu0  ;;  %v2024_v52 = vpop.f32.mrb[9].mxu1 }
 0x2c1   : > { %v2025_v53 = vadd.f32 %v2024_v52, %v1983_v51  ;;  %v1985_v54 = vpop.f32.mrb[10].mxu0  ;;  %v2026_v55 = vpop.f32.mrb[10].mxu1 }
 0x2c2   : > { %v1986_v56 = vpop.f32.mrb[11].mxu0  ;;  %v2027_v57 = vpop.f32.mrb[11].mxu1 }
 0x2ff   : > { %v2063_v58 = vpop.f32.mrb[12].mxu0  ;;  %v2104_v59 = vpop.f32.mrb[12].mxu1 }
 0x300   : > { %v2064_v60 = vadd.f32 %v2063_v58, %v2023_v50  ;;  %v2065_v61 = vpop.f32.mrb[13].mxu0  ;;  %v2106_v62 = vpop.f32.mrb[13].mxu1 }
 0x301   : > { %v2066_v63 = vadd.f32 %v2065_v61, %v2025_v53  ;;  %v2067_v2 = vpop.f32.mrb[14].mxu0  ;;  %v2108_v3 = vpop.f32.mrb[14].mxu1 }
 0x302   : > { %v2105_v4 = vadd.f32 %v2104_v59, %v2064_v60  ;;  %v2068_v5 = vpop.f32.mrb[15].mxu0  ;;  %v2109_v6 = vpop.f32.mrb[15].mxu1 }
 0x303   : > { %v2107_v7 = vadd.f32 %v2106_v62, %v2066_v63 }
 0x304   : > { %v2111_v9 = vadd.f32 %v2760_v8, %v2105_v4 }
 0x305   : > { %v2112_v11 = vadd.f32 %v2761_v10, %v2107_v7 }
 0x306   : > { %2113 = vst [vmem:[%s215_s20] sm:$0xff] %v2111_v9 }
 0x307   : > { %2114 = vst [vmem:[%s215_s20 + $0x8] sm:$0xff] %v2112_v11 }
 0x308   : > { %2861 = shalt.err (!%p2858_p2)
}
 0x309   : > { %s2862_s23 = scalar_lea.hbm %s3181_s22, 256  ;;  %s2866_s17 = scalar_lea.hbm %s3228_s3, 512 }
 0x30a   : > { %p2863_p13 = scmp.ne.s32.totalorder %s3181_s22, %s2862_s23  ;;  %p2867_p4 = scmp.lt.u32.totalorder %s3181_s22, %s3228_s3 }
 0x30b   : > { %p2868_p7 = scmp.lt.u32.totalorder %s2866_s17, %s2862_s23  ;;  %p2870_p11 = scmp.lt.u32.totalorder %s2862_s23, %s3181_s22 }
 0x30c   : > { %p2864_p6 = pnand %p2863_p13, %p3242_p0 }
 0x30d   : > { %p2869_p8 = por %p2868_p7, %p2867_p4 }
 0x30e   : > { %p2865_p10 = pneg %p2864_p6 }
 0x30f   : > { %p2871_p1 = por %p2870_p11, %p2869_p8 }
 0x311   : > { %p2872_p3 = pnand %p2871_p1, %p2865_p10 }
 0x313   : > { %2875 = shalt.err (!%p2872_p3)
}
 0x314   : > { %2505 = dma.vmem_to_hbm [thread:$0]  (%p3242_p0), %s3183_s24, 256, %s3181_s22, %s2116_s16  }
 0x315 PF: > { %s2142_s29 = sand.u32 1, %s2906_s12   ;;  %p3243_p5 = scmp.ne.s32.totalorder %s3233_s19, 0 }
 0x316   : > { %p3244_p9 = scmp.ge.s32.totalorder %s2918_s15, 2  ;;  %s2143_s30 = scalar_lea.sflag [#allocation4], %s2142_s29 }
 0x318   : > { %p2519_p12 = pnand %p3244_p9, %p3243_p5 }
 0x31a   : > { %2901 = dma.done.wait (!%p2519_p12), %s2143_s30, 256  }
 0x31b   : > { %2903 = vsyncadd (!%p2519_p12), %s2143_s30, 4294967040  ;;  %p17_p2 = scmp.ge.s32.totalorder %s3058_s6, 4   ;;  %s3245_s12 = smov %s2910_s13 }
 0x31c   : > { %s3246_s13 = smov %s2914_s14  ;;  %s3247_s14 = smov %s3067_s9 }
 0x31d   : > { %s3248_s15 = smov %s3058_s6  ;;  %19 = sbr.rel (!%p17_p2) target bundleno = 6 (0x6), region = 85 }
 0x324   :  { %2148 = vsyncpa [#allocation3], 1 }
 0x325   :  { %2150 = vsyncpa [#allocation3 + $0x1], 1 }
 0x326   :  { %2151 = vsyncpa [#allocation6], 1 }
 0x327   :  { %2152 = vsyncpa [#allocation4], 1 }
 0x328   :  { %2154 = vsyncpa [#allocation4 + $0x1], 1 }

</bundles_post_ra>
